<compile_context>
chip_gen: v7x
topology: tpu7x:2x2x1
jax: 0.10.0
libtpu: 0.0.40
codegen_flags: <defaults>
</compile_context>

<pallas_src>
import jax
import jax.numpy as jnp
from jax import lax
from jax.experimental import pallas as pl
from jax.experimental.pallas import tpu as pltpu

HEAD_W = 128  # lane-dense merged policy(12)+value(1) output width


# ----------------------------- Pallas kernel ---------------------------------
def lstm_packed_kernel(tok_ref, len_ref, t2g_ref,
                       wh1_ref, whh1_ref, b1_ref,
                       whead_ref, bhead_ref,
                       out_ref):
    TB = tok_ref.shape[0]            # T * B (time-major, flattened)
    V = t2g_ref.shape[0]             # padded vocab (16)
    H4 = t2g_ref.shape[1]            # 4H
    H = H4 // 4
    B = len_ref.shape[0]
    T = TB // B

    lengths = len_ref[...]           # (B, 1) int32

    # ---- all T layer-0 input-gate preactivations in ONE f32 matmul (bias pre-folded) ----
    tok = tok_ref[...]                                              # (T*B, 1) int32
    vocab = lax.broadcasted_iota(jnp.int32, (TB, V), 1)
    onehot = (vocab == tok).astype(jnp.float32)                     # (T*B, V)
    xg_all = jnp.dot(onehot, t2g_ref[...], preferred_element_type=jnp.float32)

    WH1 = wh1_ref[...]               # (H, 8H) bf16 = [W_ih1 | W_hh0]  (applied to h1)
    WHH1 = whh1_ref[...]             # (H, 4H) bf16                    (applied to h2)

    # ---- hoisted loop-invariants (JAX does not CSE broadcasts; build them once) ----
    B1f = jnp.broadcast_to(b1_ref[...], (B, H4))                    # (B, 4H) layer-1 bias
    lenH = jnp.broadcast_to(lengths, (B, H))                        # (B, H) for freeze mask
    lane = lax.broadcasted_iota(jnp.int32, (B, H4), 1)
    g_lanes = (lane >= 2 * H) & (lane < 3 * H)                      # gate order [i,f,g,o]
    GS = jnp.where(g_lanes, 1.0, 0.5)                               # tanh-identity scale
    GB = jnp.where(g_lanes, 0.0, 0.5)                               # tanh-identity offset

    def gate_act(gates):
        # sigmoid(x) = 0.5*(1 + tanh(x/2)) -> a single EUP tanh pass on the full 128-lane vreg
        # (g lanes get plain tanh); then static 32-lane gate slices.
        a = jnp.tanh(gates * GS) * GS + GB
        return a[:, 0:H], a[:, H:2 * H], a[:, 2 * H:3 * H], a[:, 3 * H:4 * H]

    z = jnp.zeros((B, H), jnp.float32)
    h1, c1, h2, c2 = z, z, z, z
    g0h = jnp.zeros((B, H4), jnp.float32)   # carried h1_prev @ W_hh0 (zero at t=0)
    g1h = B1f                               # carried h2_prev @ W_hh1 + b1 (h2_prev=0 at t=0)

    # Fully unrolled recurrence (T is small and static).
    for t in range(T):
        m = t < lenH                                        # (B, H) freeze mask, reused 4x
        last = t == T - 1

        # ---- layer 0: input gates precomputed; hidden gates carried from last step ----
        gates0 = xg_all[t * B:(t + 1) * B, :] + g0h
        i0, f0, g0, o0 = gate_act(gates0)
        c1n = f0 * c1 + i0 * g0
        h1n = o0 * jnp.tanh(c1n)
        h1 = jnp.where(m, h1n, h1)
        c1 = jnp.where(m, c1n, c1)

        # One bf16 dot on h1: [:, :4H] feeds layer 1 now, [:, 4H:] is next step's layer-0 carry.
        h1b = h1.astype(jnp.bfloat16)
        if last:
            # Final step: the g0h carry is never consumed -> narrow the dot to 4H columns.
            gates1 = jnp.dot(h1b, WH1[:, :H4], preferred_element_type=jnp.float32) + g1h
        else:
            p = jnp.dot(h1b, WH1, preferred_element_type=jnp.float32)   # (B, 8H)
            gates1 = p[:, 0:H4] + g1h                                   # b1 already in g1h
            g0h = p[:, H4:2 * H4]

        # ---- layer 1 ----
        i1, f1, g1, o1 = gate_act(gates1)
        c2n = f1 * c2 + i1 * g1
        h2n = o1 * jnp.tanh(c2n)
        h2 = jnp.where(m, h2n, h2)
        c2 = jnp.where(m, c2n, c2)

        if not last:
            # Next step's layer-1 hidden contribution (+bias), off the next layer-0 critical path.
            g1h = jnp.dot(h2.astype(jnp.bfloat16), WHH1,
                          preferred_element_type=jnp.float32) + B1f

    # Merged policy+value heads: single lane-dense (B, 128) f32 output, one dot, one store.
    out_ref[...] = (jnp.dot(h2, whead_ref[...], preferred_element_type=jnp.float32)
                    + bhead_ref[...])


# ------------------------------ host wrapper ---------------------------------
def pack_kernel_params(params):
    """One-time repacking of PyTorch-layout params into kernel-friendly fused/padded forms."""
    E = params["embedding"].shape[1]
    H = params["whh0_T"].shape[0]
    emb16 = jnp.zeros((16, E), jnp.float32).at[:13].set(params["embedding"])  # pad vocab to 16
    # token-id -> layer-0 input-gate table, layer-0 bias folded in (one-hot rows sum to 1).
    tok2gate = jnp.dot(emb16, params["wih0_T"],
                       precision=lax.Precision.HIGHEST) + params["b0"]        # (16, 4H) f32
    # Applied to h1: [W_ih1 | W_hh0] so one bf16 dot yields this-step layer-1 gates and
    # next-step layer-0 hidden gates (aligned 128-lane split).
    wh1 = jnp.concatenate([params["wih1_T"], params["whh0_T"]], axis=1)       # (H, 8H)
    whead = jnp.concatenate([params["wp_T"], params["wv_T"]], axis=1)         # (H, 13)
    whead = jnp.pad(whead, ((0, 0), (0, HEAD_W - whead.shape[1])))            # (H, 128)
    bhead = jnp.concatenate([params["bp"], params["bv"]], axis=1)             # (1, 13)
    bhead = jnp.pad(bhead, ((0, 0), (0, HEAD_W - bhead.shape[1])))            # (1, 128)
    return {
        "tok2gate": tok2gate,
        "wh1": wh1.astype(jnp.bfloat16),        # bf16 MXU operands for the in-loop dots
        "whh1": params["whh1_T"].astype(jnp.bfloat16),
        "b1": params["b1"],
        "whead": whead, "bhead": bhead,         # head stays f32 (once per call, off hot path)
    }


@jax.jit
def lstm_packed_forward(tokens, lengths, kparams):
    """tokens: (B, T) int32 in [0, 12]; lengths: (B,) int32 (>=1)."""
    B, T = tokens.shape

    # Pad batch to a full sublane group (8); larger batches just grow the rows of every dot.
    Bp = max(8, ((B + 7) // 8) * 8)
    pad = Bp - B
    tok_pad = jnp.pad(tokens.astype(jnp.int32), ((0, pad), (0, 0)), constant_values=12)
    len_pad = jnp.pad(lengths.astype(jnp.int32), (0, pad)).reshape(Bp, 1)
    # Time-major flattened token ids (tiny int32 reshape; the float (T,B,E) tensor is never built).
    tok_tm = jnp.transpose(tok_pad, (1, 0)).reshape(T * Bp, 1)

    vmem = pl.BlockSpec(memory_space=pltpu.MemorySpace.VMEM)
    out = pl.pallas_call(
        lstm_packed_kernel,
        out_shape=jax.ShapeDtypeStruct((Bp, HEAD_W), jnp.float32),
        in_specs=[vmem] * 8,
        out_specs=vmem,
    )(tok_tm, len_pad,
      kparams["tok2gate"], kparams["wh1"], kparams["whh1"], kparams["b1"],
      kparams["whead"], kparams["bhead"])

    policy = out[:B, :12]
    value = out[:B, 12:13]
    return policy, value


# ------------------------- deterministic parameters ---------------------------
def init_params(key, embd_size, hidden_size):
    E, H = embd_size, hidden_size
    ks = jax.random.split(key, 16)
    s = 1.0 / jnp.sqrt(H)

    def u(k, shape):
        return jax.random.uniform(k, shape, jnp.float32, -s, s)

    emb = jax.random.normal(ks[0], (13, E), jnp.float32)
    emb = emb.at[12].set(0.0)                                 # padding_idx=12

    # PyTorch LSTM weight layout: weight_ih_l* is (4H, in), gate order [i, f, g, o].
    wih0 = u(ks[1], (4 * H, E))
    whh0 = u(ks[2], (4 * H, H))
    bih0 = u(ks[3], (4 * H,))
    bhh0 = u(ks[4], (4 * H,))
    wih1 = u(ks[5], (4 * H, H))
    whh1 = u(ks[6], (4 * H, H))
    bih1 = u(ks[7], (4 * H,))
    bhh1 = u(ks[8], (4 * H,))

    wv = u(ks[9], (1, H))
    bv = u(ks[10], (1,))
    wp = u(ks[11], (12, H))
    bp = u(ks[12], (12,))

    return {
        "embedding": emb,
        "wih0_T": wih0.T, "whh0_T": whh0.T, "b0": (bih0 + bhh0).reshape(1, 4 * H),
        "wih1_T": wih1.T, "whh1_T": whh1.T, "b1": (bih1 + bhh1).reshape(1, 4 * H),
        "wp_T": wp.T, "bp": bp.reshape(1, 12),
        "wv_T": wv.T, "bv": bv.reshape(1, 1),
    }


# ------------------------------- pure-JAX reference ---------------------------
def reference_forward(tokens, lengths, params):
    B, T = tokens.shape
    H = params["whh0_T"].shape[0]
    emb = params["embedding"][tokens].astype(jnp.float32)     # (B, T, E)
    lens = lengths.astype(jnp.int32).reshape(B, 1)

    def cell(x_t, h, c, WIH, WHH, Bb):
        gates = x_t @ WIH + h @ WHH + Bb
        i = jax.nn.sigmoid(gates[:, 0 * H:1 * H])
        f = jax.nn.sigmoid(gates[:, 1 * H:2 * H])
        g = jnp.tanh(gates[:, 2 * H:3 * H])
        o = jax.nn.sigmoid(gates[:, 3 * H:4 * H])
        c_new = f * c + i * g
        return o * jnp.tanh(c_new), c_new

    h1 = c1 = h2 = c2 = jnp.zeros((B, H), jnp.float32)
    for t in range(T):
        x_t = emb[:, t, :]
        mask = t < lens
        h1n, c1n = cell(x_t, h1, c1, params["wih0_T"], params["whh0_T"], params["b0"])
        h1 = jnp.where(mask, h1n, h1)
        c1 = jnp.where(mask, c1n, c1)
        h2n, c2n = cell(h1, h2, c2, params["wih1_T"], params["whh1_T"], params["b1"])
        h2 = jnp.where(mask, h2n, h2)
        c2 = jnp.where(mask, c2n, c2)
    policy = h2 @ params["wp_T"] + params["bp"]
    value = h2 @ params["wv_T"] + params["bv"]
    return policy, value


if __name__ == "__main__":
    B, T, E, H = 2, 8, 16, 32
    key = jax.random.PRNGKey(0)
    kp, kx = jax.random.split(key)
    params = init_params(kp, E, H)
    kparams = pack_kernel_params(params)

    tokens = jax.random.randint(kx, (B, T), 0, 13, dtype=jnp.int32)
    lengths = jnp.array([8, 5], dtype=jnp.int32)
    # Zero-out (pad) positions past each sequence's length, as a padded batch would be.
    pad_mask = jnp.arange(T)[None, :] < lengths[:, None]
    tokens = jnp.where(pad_mask, tokens, 12)

    policy, value = lstm_packed_forward(tokens, lengths, kparams)
    jax.block_until_ready((policy, value))

    ref_p, ref_v = reference_forward(tokens, lengths, params)
    assert policy.shape == (B, 12) and value.shape == (B, 1)
    assert jnp.allclose(policy, ref_p, atol=1e-3, rtol=1e-3)
    assert jnp.allclose(value, ref_v, atol=1e-3, rtol=1e-3)

    print("KERNEL_OK")
</pallas_src>

<mosaic_0001>
module attributes {stable_mosaic.version = 11 : i64} {
  func.func @lstm_packed_kernel(%arg0: memref<64x1xi32, #tpu.memory_space<vmem>>, %arg1: memref<8x1xi32, #tpu.memory_space<vmem>>, %arg2: memref<16x128xf32, #tpu.memory_space<vmem>>, %arg3: memref<32x256xbf16, #tpu.memory_space<vmem>>, %arg4: memref<32x128xbf16, #tpu.memory_space<vmem>>, %arg5: memref<1x128xf32, #tpu.memory_space<vmem>>, %arg6: memref<32x128xf32, #tpu.memory_space<vmem>>, %arg7: memref<1x128xf32, #tpu.memory_space<vmem>>, %arg8: memref<8x128xf32, #tpu.memory_space<vmem>>) attributes {dimension_semantics = [], scalar_prefetch = 0 : i64, scratch_operands = 0 : i64, tpu.core_type = #tpu.core_type<tc>} {
    %c0 = arith.constant 0 : index
    %c0_0 = arith.constant 0 : index
    %0 = vector.load %arg1[%c0, %c0_0] : memref<8x1xi32, #tpu.memory_space<vmem>>, vector<8x1xi32>
    %c0_1 = arith.constant 0 : index
    %c0_2 = arith.constant 0 : index
    %1 = vector.load %arg0[%c0_1, %c0_2] : memref<64x1xi32, #tpu.memory_space<vmem>>, vector<64x1xi32>
    %2 = tpu.iota {dimensions = array<i32: 1>} : vector<64x16xi32>
    %3 = vector.broadcast %1 : vector<64x1xi32> to vector<64x16xi32>
    %4 = arith.cmpi eq, %2, %3 : vector<64x16xi32>
    %5 = arith.extui %4 : vector<64x16xi1> to vector<64x16xi32>
    %6 = arith.sitofp %5 : vector<64x16xi32> to vector<64x16xf32>
    %c0_3 = arith.constant 0 : index
    %c0_4 = arith.constant 0 : index
    %7 = vector.load %arg2[%c0_3, %c0_4] : memref<16x128xf32, #tpu.memory_space<vmem>>, vector<16x128xf32>
    %cst = arith.constant dense<0.000000e+00> : vector<64x128xf32>
    %8 = tpu.matmul %6, %7, %cst {dimension_numbers = #tpu.dot_dimension_numbers<[1], [0], [0], [1], [0, 0, 1, 1], [], []>} : vector<64x16xf32>, vector<16x128xf32>, vector<64x128xf32> -> vector<64x128xf32>
    %c0_5 = arith.constant 0 : index
    %c0_6 = arith.constant 0 : index
    %9 = vector.load %arg3[%c0_5, %c0_6] : memref<32x256xbf16, #tpu.memory_space<vmem>>, vector<32x256xbf16>
    %c0_7 = arith.constant 0 : index
    %c0_8 = arith.constant 0 : index
    %10 = vector.load %arg4[%c0_7, %c0_8] : memref<32x128xbf16, #tpu.memory_space<vmem>>, vector<32x128xbf16>
    %c0_9 = arith.constant 0 : index
    %c0_10 = arith.constant 0 : index
    %11 = vector.load %arg5[%c0_9, %c0_10] : memref<1x128xf32, #tpu.memory_space<vmem>>, vector<1x128xf32>
    %12 = vector.shape_cast %11 : vector<1x128xf32> to vector<1x128xf32>
    %13 = vector.broadcast %12 : vector<1x128xf32> to vector<8x128xf32>
    %14 = vector.shape_cast %0 : vector<8x1xi32> to vector<8x1xi32>
    %15 = vector.broadcast %14 : vector<8x1xi32> to vector<8x32xi32>
    %16 = tpu.iota {dimensions = array<i32: 1>} : vector<8x128xi32>
    %c64_i32 = arith.constant 64 : i32
    %17 = vector.broadcast %c64_i32 : i32 to vector<8x128xi32>
    %18 = arith.cmpi sge, %16, %17 : vector<8x128xi32>
    %c96_i32 = arith.constant 96 : i32
    %19 = vector.broadcast %c96_i32 : i32 to vector<8x128xi32>
    %20 = arith.cmpi slt, %16, %19 : vector<8x128xi32>
    %21 = arith.andi %18, %20 : vector<8x128xi1>
    %cst_11 = arith.constant 1.000000e+00 : f32
    %cst_12 = arith.constant 5.000000e-01 : f32
    %22 = vector.broadcast %cst_11 : f32 to vector<8x128xf32>
    %23 = vector.broadcast %cst_12 : f32 to vector<8x128xf32>
    %24 = arith.select %21, %22, %23 : vector<8x128xi1>, vector<8x128xf32>
    %cst_13 = arith.constant 0.000000e+00 : f32
    %cst_14 = arith.constant 5.000000e-01 : f32
    %25 = vector.broadcast %cst_13 : f32 to vector<8x128xf32>
    %26 = vector.broadcast %cst_14 : f32 to vector<8x128xf32>
    %27 = arith.select %21, %25, %26 : vector<8x128xi1>, vector<8x128xf32>
    %cst_15 = arith.constant 0.000000e+00 : f32
    %28 = vector.broadcast %cst_15 : f32 to vector<8x32xf32>
    %cst_16 = arith.constant 0.000000e+00 : f32
    %29 = vector.broadcast %cst_16 : f32 to vector<8x128xf32>
    %c0_i32 = arith.constant 0 : i32
    %30 = vector.broadcast %c0_i32 : i32 to vector<8x32xi32>
    %31 = arith.cmpi sgt, %15, %30 : vector<8x32xi32>
    %32 = vector.extract_strided_slice %8 {offsets = [0, 0], sizes = [8, 128], strides = [1, 1]} : vector<64x128xf32> to vector<8x128xf32>
    %33 = arith.addf %32, %29 : vector<8x128xf32>
    %34 = arith.mulf %33, %24 : vector<8x128xf32>
    %35 = math.tanh %34 : vector<8x128xf32>
    %36 = arith.mulf %35, %24 : vector<8x128xf32>
    %37 = arith.addf %36, %27 : vector<8x128xf32>
    %38 = vector.extract_strided_slice %37 {offsets = [0, 0], sizes = [8, 32], strides = [1, 1]} : vector<8x128xf32> to vector<8x32xf32>
    %39 = vector.extract_strided_slice %37 {offsets = [0, 32], sizes = [8, 32], strides = [1, 1]} : vector<8x128xf32> to vector<8x32xf32>
    %40 = vector.extract_strided_slice %37 {offsets = [0, 64], sizes = [8, 32], strides = [1, 1]} : vector<8x128xf32> to vector<8x32xf32>
    %41 = vector.extract_strided_slice %37 {offsets = [0, 96], sizes = [8, 32], strides = [1, 1]} : vector<8x128xf32> to vector<8x32xf32>
    %42 = arith.mulf %39, %28 : vector<8x32xf32>
    %43 = arith.mulf %38, %40 : vector<8x32xf32>
    %44 = arith.addf %42, %43 : vector<8x32xf32>
    %45 = math.tanh %44 : vector<8x32xf32>
    %46 = arith.mulf %41, %45 : vector<8x32xf32>
    %47 = arith.select %31, %46, %28 : vector<8x32xi1>, vector<8x32xf32>
    %48 = arith.select %31, %44, %28 : vector<8x32xi1>, vector<8x32xf32>
    %49 = arith.truncf %47 : vector<8x32xf32> to vector<8x32xbf16>
    %cst_17 = arith.constant dense<0.000000e+00> : vector<8x256xf32>
    %50 = tpu.matmul %49, %9, %cst_17 {dimension_numbers = #tpu.dot_dimension_numbers<[1], [0], [0], [1], [0, 0, 1, 1], [], []>} : vector<8x32xbf16>, vector<32x256xbf16>, vector<8x256xf32> -> vector<8x256xf32>
    %51 = vector.extract_strided_slice %50 {offsets = [0, 0], sizes = [8, 128], strides = [1, 1]} : vector<8x256xf32> to vector<8x128xf32>
    %52 = arith.addf %51, %13 : vector<8x128xf32>
    %53 = vector.extract_strided_slice %50 {offsets = [0, 128], sizes = [8, 128], strides = [1, 1]} : vector<8x256xf32> to vector<8x128xf32>
    %54 = arith.mulf %52, %24 : vector<8x128xf32>
    %55 = math.tanh %54 : vector<8x128xf32>
    %56 = arith.mulf %55, %24 : vector<8x128xf32>
    %57 = arith.addf %56, %27 : vector<8x128xf32>
    %58 = vector.extract_strided_slice %57 {offsets = [0, 0], sizes = [8, 32], strides = [1, 1]} : vector<8x128xf32> to vector<8x32xf32>
    %59 = vector.extract_strided_slice %57 {offsets = [0, 32], sizes = [8, 32], strides = [1, 1]} : vector<8x128xf32> to vector<8x32xf32>
    %60 = vector.extract_strided_slice %57 {offsets = [0, 64], sizes = [8, 32], strides = [1, 1]} : vector<8x128xf32> to vector<8x32xf32>
    %61 = vector.extract_strided_slice %57 {offsets = [0, 96], sizes = [8, 32], strides = [1, 1]} : vector<8x128xf32> to vector<8x32xf32>
    %62 = arith.mulf %59, %28 : vector<8x32xf32>
    %63 = arith.mulf %58, %60 : vector<8x32xf32>
    %64 = arith.addf %62, %63 : vector<8x32xf32>
    %65 = math.tanh %64 : vector<8x32xf32>
    %66 = arith.mulf %61, %65 : vector<8x32xf32>
    %67 = arith.select %31, %66, %28 : vector<8x32xi1>, vector<8x32xf32>
    %68 = arith.select %31, %64, %28 : vector<8x32xi1>, vector<8x32xf32>
    %69 = arith.truncf %67 : vector<8x32xf32> to vector<8x32xbf16>
    %cst_18 = arith.constant dense<0.000000e+00> : vector<8x128xf32>
    %70 = tpu.matmul %69, %10, %cst_18 {dimension_numbers = #tpu.dot_dimension_numbers<[1], [0], [0], [1], [0, 0, 1, 1], [], []>} : vector<8x32xbf16>, vector<32x128xbf16>, vector<8x128xf32> -> vector<8x128xf32>
    %71 = arith.addf %70, %13 : vector<8x128xf32>
    %c1_i32 = arith.constant 1 : i32
    %72 = vector.broadcast %c1_i32 : i32 to vector<8x32xi32>
    %73 = arith.cmpi sgt, %15, %72 : vector<8x32xi32>
    %74 = vector.extract_strided_slice %8 {offsets = [8, 0], sizes = [8, 128], strides = [1, 1]} : vector<64x128xf32> to vector<8x128xf32>
    %75 = arith.addf %74, %53 : vector<8x128xf32>
    %76 = arith.mulf %75, %24 : vector<8x128xf32>
    %77 = math.tanh %76 : vector<8x128xf32>
    %78 = arith.mulf %77, %24 : vector<8x128xf32>
    %79 = arith.addf %78, %27 : vector<8x128xf32>
    %80 = vector.extract_strided_slice %79 {offsets = [0, 0], sizes = [8, 32], strides = [1, 1]} : vector<8x128xf32> to vector<8x32xf32>
    %81 = vector.extract_strided_slice %79 {offsets = [0, 32], sizes = [8, 32], strides = [1, 1]} : vector<8x128xf32> to vector<8x32xf32>
    %82 = vector.extract_strided_slice %79 {offsets = [0, 64], sizes = [8, 32], strides = [1, 1]} : vector<8x128xf32> to vector<8x32xf32>
    %83 = vector.extract_strided_slice %79 {offsets = [0, 96], sizes = [8, 32], strides = [1, 1]} : vector<8x128xf32> to vector<8x32xf32>
    %84 = arith.mulf %81, %48 : vector<8x32xf32>
    %85 = arith.mulf %80, %82 : vector<8x32xf32>
    %86 = arith.addf %84, %85 : vector<8x32xf32>
    %87 = math.tanh %86 : vector<8x32xf32>
    %88 = arith.mulf %83, %87 : vector<8x32xf32>
    %89 = arith.select %73, %88, %47 : vector<8x32xi1>, vector<8x32xf32>
    %90 = arith.select %73, %86, %48 : vector<8x32xi1>, vector<8x32xf32>
    %91 = arith.truncf %89 : vector<8x32xf32> to vector<8x32xbf16>
    %cst_19 = arith.constant dense<0.000000e+00> : vector<8x256xf32>
    %92 = tpu.matmul %91, %9, %cst_19 {dimension_numbers = #tpu.dot_dimension_numbers<[1], [0], [0], [1], [0, 0, 1, 1], [], []>} : vector<8x32xbf16>, vector<32x256xbf16>, vector<8x256xf32> -> vector<8x256xf32>
    %93 = vector.extract_strided_slice %92 {offsets = [0, 0], sizes = [8, 128], strides = [1, 1]} : vector<8x256xf32> to vector<8x128xf32>
    %94 = arith.addf %93, %71 : vector<8x128xf32>
    %95 = vector.extract_strided_slice %92 {offsets = [0, 128], sizes = [8, 128], strides = [1, 1]} : vector<8x256xf32> to vector<8x128xf32>
    %96 = arith.mulf %94, %24 : vector<8x128xf32>
    %97 = math.tanh %96 : vector<8x128xf32>
    %98 = arith.mulf %97, %24 : vector<8x128xf32>
    %99 = arith.addf %98, %27 : vector<8x128xf32>
    %100 = vector.extract_strided_slice %99 {offsets = [0, 0], sizes = [8, 32], strides = [1, 1]} : vector<8x128xf32> to vector<8x32xf32>
    %101 = vector.extract_strided_slice %99 {offsets = [0, 32], sizes = [8, 32], strides = [1, 1]} : vector<8x128xf32> to vector<8x32xf32>
    %102 = vector.extract_strided_slice %99 {offsets = [0, 64], sizes = [8, 32], strides = [1, 1]} : vector<8x128xf32> to vector<8x32xf32>
    %103 = vector.extract_strided_slice %99 {offsets = [0, 96], sizes = [8, 32], strides = [1, 1]} : vector<8x128xf32> to vector<8x32xf32>
    %104 = arith.mulf %101, %68 : vector<8x32xf32>
    %105 = arith.mulf %100, %102 : vector<8x32xf32>
    %106 = arith.addf %104, %105 : vector<8x32xf32>
    %107 = math.tanh %106 : vector<8x32xf32>
    %108 = arith.mulf %103, %107 : vector<8x32xf32>
    %109 = arith.select %73, %108, %67 : vector<8x32xi1>, vector<8x32xf32>
    %110 = arith.select %73, %106, %68 : vector<8x32xi1>, vector<8x32xf32>
    %111 = arith.truncf %109 : vector<8x32xf32> to vector<8x32xbf16>
    %cst_20 = arith.constant dense<0.000000e+00> : vector<8x128xf32>
    %112 = tpu.matmul %111, %10, %cst_20 {dimension_numbers = #tpu.dot_dimension_numbers<[1], [0], [0], [1], [0, 0, 1, 1], [], []>} : vector<8x32xbf16>, vector<32x128xbf16>, vector<8x128xf32> -> vector<8x128xf32>
    %113 = arith.addf %112, %13 : vector<8x128xf32>
    %c2_i32 = arith.constant 2 : i32
    %114 = vector.broadcast %c2_i32 : i32 to vector<8x32xi32>
    %115 = arith.cmpi sgt, %15, %114 : vector<8x32xi32>
    %116 = vector.extract_strided_slice %8 {offsets = [16, 0], sizes = [8, 128], strides = [1, 1]} : vector<64x128xf32> to vector<8x128xf32>
    %117 = arith.addf %116, %95 : vector<8x128xf32>
    %118 = arith.mulf %117, %24 : vector<8x128xf32>
    %119 = math.tanh %118 : vector<8x128xf32>
    %120 = arith.mulf %119, %24 : vector<8x128xf32>
    %121 = arith.addf %120, %27 : vector<8x128xf32>
    %122 = vector.extract_strided_slice %121 {offsets = [0, 0], sizes = [8, 32], strides = [1, 1]} : vector<8x128xf32> to vector<8x32xf32>
    %123 = vector.extract_strided_slice %121 {offsets = [0, 32], sizes = [8, 32], strides = [1, 1]} : vector<8x128xf32> to vector<8x32xf32>
    %124 = vector.extract_strided_slice %121 {offsets = [0, 64], sizes = [8, 32], strides = [1, 1]} : vector<8x128xf32> to vector<8x32xf32>
    %125 = vector.extract_strided_slice %121 {offsets = [0, 96], sizes = [8, 32], strides = [1, 1]} : vector<8x128xf32> to vector<8x32xf32>
    %126 = arith.mulf %123, %90 : vector<8x32xf32>
    %127 = arith.mulf %122, %124 : vector<8x32xf32>
    %128 = arith.addf %126, %127 : vector<8x32xf32>
    %129 = math.tanh %128 : vector<8x32xf32>
    %130 = arith.mulf %125, %129 : vector<8x32xf32>
    %131 = arith.select %115, %130, %89 : vector<8x32xi1>, vector<8x32xf32>
    %132 = arith.select %115, %128, %90 : vector<8x32xi1>, vector<8x32xf32>
    %133 = arith.truncf %131 : vector<8x32xf32> to vector<8x32xbf16>
    %cst_21 = arith.constant dense<0.000000e+00> : vector<8x256xf32>
    %134 = tpu.matmul %133, %9, %cst_21 {dimension_numbers = #tpu.dot_dimension_numbers<[1], [0], [0], [1], [0, 0, 1, 1], [], []>} : vector<8x32xbf16>, vector<32x256xbf16>, vector<8x256xf32> -> vector<8x256xf32>
    %135 = vector.extract_strided_slice %134 {offsets = [0, 0], sizes = [8, 128], strides = [1, 1]} : vector<8x256xf32> to vector<8x128xf32>
    %136 = arith.addf %135, %113 : vector<8x128xf32>
    %137 = vector.extract_strided_slice %134 {offsets = [0, 128], sizes = [8, 128], strides = [1, 1]} : vector<8x256xf32> to vector<8x128xf32>
    %138 = arith.mulf %136, %24 : vector<8x128xf32>
    %139 = math.tanh %138 : vector<8x128xf32>
    %140 = arith.mulf %139, %24 : vector<8x128xf32>
    %141 = arith.addf %140, %27 : vector<8x128xf32>
    %142 = vector.extract_strided_slice %141 {offsets = [0, 0], sizes = [8, 32], strides = [1, 1]} : vector<8x128xf32> to vector<8x32xf32>
    %143 = vector.extract_strided_slice %141 {offsets = [0, 32], sizes = [8, 32], strides = [1, 1]} : vector<8x128xf32> to vector<8x32xf32>
    %144 = vector.extract_strided_slice %141 {offsets = [0, 64], sizes = [8, 32], strides = [1, 1]} : vector<8x128xf32> to vector<8x32xf32>
    %145 = vector.extract_strided_slice %141 {offsets = [0, 96], sizes = [8, 32], strides = [1, 1]} : vector<8x128xf32> to vector<8x32xf32>
    %146 = arith.mulf %143, %110 : vector<8x32xf32>
    %147 = arith.mulf %142, %144 : vector<8x32xf32>
    %148 = arith.addf %146, %147 : vector<8x32xf32>
    %149 = math.tanh %148 : vector<8x32xf32>
    %150 = arith.mulf %145, %149 : vector<8x32xf32>
    %151 = arith.select %115, %150, %109 : vector<8x32xi1>, vector<8x32xf32>
    %152 = arith.select %115, %148, %110 : vector<8x32xi1>, vector<8x32xf32>
    %153 = arith.truncf %151 : vector<8x32xf32> to vector<8x32xbf16>
    %cst_22 = arith.constant dense<0.000000e+00> : vector<8x128xf32>
    %154 = tpu.matmul %153, %10, %cst_22 {dimension_numbers = #tpu.dot_dimension_numbers<[1], [0], [0], [1], [0, 0, 1, 1], [], []>} : vector<8x32xbf16>, vector<32x128xbf16>, vector<8x128xf32> -> vector<8x128xf32>
    %155 = arith.addf %154, %13 : vector<8x128xf32>
    %c3_i32 = arith.constant 3 : i32
    %156 = vector.broadcast %c3_i32 : i32 to vector<8x32xi32>
    %157 = arith.cmpi sgt, %15, %156 : vector<8x32xi32>
    %158 = vector.extract_strided_slice %8 {offsets = [24, 0], sizes = [8, 128], strides = [1, 1]} : vector<64x128xf32> to vector<8x128xf32>
    %159 = arith.addf %158, %137 : vector<8x128xf32>
    %160 = arith.mulf %159, %24 : vector<8x128xf32>
    %161 = math.tanh %160 : vector<8x128xf32>
    %162 = arith.mulf %161, %24 : vector<8x128xf32>
    %163 = arith.addf %162, %27 : vector<8x128xf32>
    %164 = vector.extract_strided_slice %163 {offsets = [0, 0], sizes = [8, 32], strides = [1, 1]} : vector<8x128xf32> to vector<8x32xf32>
    %165 = vector.extract_strided_slice %163 {offsets = [0, 32], sizes = [8, 32], strides = [1, 1]} : vector<8x128xf32> to vector<8x32xf32>
    %166 = vector.extract_strided_slice %163 {offsets = [0, 64], sizes = [8, 32], strides = [1, 1]} : vector<8x128xf32> to vector<8x32xf32>
    %167 = vector.extract_strided_slice %163 {offsets = [0, 96], sizes = [8, 32], strides = [1, 1]} : vector<8x128xf32> to vector<8x32xf32>
    %168 = arith.mulf %165, %132 : vector<8x32xf32>
    %169 = arith.mulf %164, %166 : vector<8x32xf32>
    %170 = arith.addf %168, %169 : vector<8x32xf32>
    %171 = math.tanh %170 : vector<8x32xf32>
    %172 = arith.mulf %167, %171 : vector<8x32xf32>
    %173 = arith.select %157, %172, %131 : vector<8x32xi1>, vector<8x32xf32>
    %174 = arith.select %157, %170, %132 : vector<8x32xi1>, vector<8x32xf32>
    %175 = arith.truncf %173 : vector<8x32xf32> to vector<8x32xbf16>
    %cst_23 = arith.constant dense<0.000000e+00> : vector<8x256xf32>
    %176 = tpu.matmul %175, %9, %cst_23 {dimension_numbers = #tpu.dot_dimension_numbers<[1], [0], [0], [1], [0, 0, 1, 1], [], []>} : vector<8x32xbf16>, vector<32x256xbf16>, vector<8x256xf32> -> vector<8x256xf32>
    %177 = vector.extract_strided_slice %176 {offsets = [0, 0], sizes = [8, 128], strides = [1, 1]} : vector<8x256xf32> to vector<8x128xf32>
    %178 = arith.addf %177, %155 : vector<8x128xf32>
    %179 = vector.extract_strided_slice %176 {offsets = [0, 128], sizes = [8, 128], strides = [1, 1]} : vector<8x256xf32> to vector<8x128xf32>
    %180 = arith.mulf %178, %24 : vector<8x128xf32>
    %181 = math.tanh %180 : vector<8x128xf32>
    %182 = arith.mulf %181, %24 : vector<8x128xf32>
    %183 = arith.addf %182, %27 : vector<8x128xf32>
    %184 = vector.extract_strided_slice %183 {offsets = [0, 0], sizes = [8, 32], strides = [1, 1]} : vector<8x128xf32> to vector<8x32xf32>
    %185 = vector.extract_strided_slice %183 {offsets = [0, 32], sizes = [8, 32], strides = [1, 1]} : vector<8x128xf32> to vector<8x32xf32>
    %186 = vector.extract_strided_slice %183 {offsets = [0, 64], sizes = [8, 32], strides = [1, 1]} : vector<8x128xf32> to vector<8x32xf32>
    %187 = vector.extract_strided_slice %183 {offsets = [0, 96], sizes = [8, 32], strides = [1, 1]} : vector<8x128xf32> to vector<8x32xf32>
    %188 = arith.mulf %185, %152 : vector<8x32xf32>
    %189 = arith.mulf %184, %186 : vector<8x32xf32>
    %190 = arith.addf %188, %189 : vector<8x32xf32>
    %191 = math.tanh %190 : vector<8x32xf32>
    %192 = arith.mulf %187, %191 : vector<8x32xf32>
    %193 = arith.select %157, %192, %151 : vector<8x32xi1>, vector<8x32xf32>
    %194 = arith.select %157, %190, %152 : vector<8x32xi1>, vector<8x32xf32>
    %195 = arith.truncf %193 : vector<8x32xf32> to vector<8x32xbf16>
    %cst_24 = arith.constant dense<0.000000e+00> : vector<8x128xf32>
    %196 = tpu.matmul %195, %10, %cst_24 {dimension_numbers = #tpu.dot_dimension_numbers<[1], [0], [0], [1], [0, 0, 1, 1], [], []>} : vector<8x32xbf16>, vector<32x128xbf16>, vector<8x128xf32> -> vector<8x128xf32>
    %197 = arith.addf %196, %13 : vector<8x128xf32>
    %c4_i32 = arith.constant 4 : i32
    %198 = vector.broadcast %c4_i32 : i32 to vector<8x32xi32>
    %199 = arith.cmpi sgt, %15, %198 : vector<8x32xi32>
    %200 = vector.extract_strided_slice %8 {offsets = [32, 0], sizes = [8, 128], strides = [1, 1]} : vector<64x128xf32> to vector<8x128xf32>
    %201 = arith.addf %200, %179 : vector<8x128xf32>
    %202 = arith.mulf %201, %24 : vector<8x128xf32>
    %203 = math.tanh %202 : vector<8x128xf32>
    %204 = arith.mulf %203, %24 : vector<8x128xf32>
    %205 = arith.addf %204, %27 : vector<8x128xf32>
    %206 = vector.extract_strided_slice %205 {offsets = [0, 0], sizes = [8, 32], strides = [1, 1]} : vector<8x128xf32> to vector<8x32xf32>
    %207 = vector.extract_strided_slice %205 {offsets = [0, 32], sizes = [8, 32], strides = [1, 1]} : vector<8x128xf32> to vector<8x32xf32>
    %208 = vector.extract_strided_slice %205 {offsets = [0, 64], sizes = [8, 32], strides = [1, 1]} : vector<8x128xf32> to vector<8x32xf32>
    %209 = vector.extract_strided_slice %205 {offsets = [0, 96], sizes = [8, 32], strides = [1, 1]} : vector<8x128xf32> to vector<8x32xf32>
    %210 = arith.mulf %207, %174 : vector<8x32xf32>
    %211 = arith.mulf %206, %208 : vector<8x32xf32>
    %212 = arith.addf %210, %211 : vector<8x32xf32>
    %213 = math.tanh %212 : vector<8x32xf32>
    %214 = arith.mulf %209, %213 : vector<8x32xf32>
    %215 = arith.select %199, %214, %173 : vector<8x32xi1>, vector<8x32xf32>
    %216 = arith.select %199, %212, %174 : vector<8x32xi1>, vector<8x32xf32>
    %217 = arith.truncf %215 : vector<8x32xf32> to vector<8x32xbf16>
    %cst_25 = arith.constant dense<0.000000e+00> : vector<8x256xf32>
    %218 = tpu.matmul %217, %9, %cst_25 {dimension_numbers = #tpu.dot_dimension_numbers<[1], [0], [0], [1], [0, 0, 1, 1], [], []>} : vector<8x32xbf16>, vector<32x256xbf16>, vector<8x256xf32> -> vector<8x256xf32>
    %219 = vector.extract_strided_slice %218 {offsets = [0, 0], sizes = [8, 128], strides = [1, 1]} : vector<8x256xf32> to vector<8x128xf32>
    %220 = arith.addf %219, %197 : vector<8x128xf32>
    %221 = vector.extract_strided_slice %218 {offsets = [0, 128], sizes = [8, 128], strides = [1, 1]} : vector<8x256xf32> to vector<8x128xf32>
    %222 = arith.mulf %220, %24 : vector<8x128xf32>
    %223 = math.tanh %222 : vector<8x128xf32>
    %224 = arith.mulf %223, %24 : vector<8x128xf32>
    %225 = arith.addf %224, %27 : vector<8x128xf32>
    %226 = vector.extract_strided_slice %225 {offsets = [0, 0], sizes = [8, 32], strides = [1, 1]} : vector<8x128xf32> to vector<8x32xf32>
    %227 = vector.extract_strided_slice %225 {offsets = [0, 32], sizes = [8, 32], strides = [1, 1]} : vector<8x128xf32> to vector<8x32xf32>
    %228 = vector.extract_strided_slice %225 {offsets = [0, 64], sizes = [8, 32], strides = [1, 1]} : vector<8x128xf32> to vector<8x32xf32>
    %229 = vector.extract_strided_slice %225 {offsets = [0, 96], sizes = [8, 32], strides = [1, 1]} : vector<8x128xf32> to vector<8x32xf32>
    %230 = arith.mulf %227, %194 : vector<8x32xf32>
    %231 = arith.mulf %226, %228 : vector<8x32xf32>
    %232 = arith.addf %230, %231 : vector<8x32xf32>
    %233 = math.tanh %232 : vector<8x32xf32>
    %234 = arith.mulf %229, %233 : vector<8x32xf32>
    %235 = arith.select %199, %234, %193 : vector<8x32xi1>, vector<8x32xf32>
    %236 = arith.select %199, %232, %194 : vector<8x32xi1>, vector<8x32xf32>
    %237 = arith.truncf %235 : vector<8x32xf32> to vector<8x32xbf16>
    %cst_26 = arith.constant dense<0.000000e+00> : vector<8x128xf32>
    %238 = tpu.matmul %237, %10, %cst_26 {dimension_numbers = #tpu.dot_dimension_numbers<[1], [0], [0], [1], [0, 0, 1, 1], [], []>} : vector<8x32xbf16>, vector<32x128xbf16>, vector<8x128xf32> -> vector<8x128xf32>
    %239 = arith.addf %238, %13 : vector<8x128xf32>
    %c5_i32 = arith.constant 5 : i32
    %240 = vector.broadcast %c5_i32 : i32 to vector<8x32xi32>
    %241 = arith.cmpi sgt, %15, %240 : vector<8x32xi32>
    %242 = vector.extract_strided_slice %8 {offsets = [40, 0], sizes = [8, 128], strides = [1, 1]} : vector<64x128xf32> to vector<8x128xf32>
    %243 = arith.addf %242, %221 : vector<8x128xf32>
    %244 = arith.mulf %243, %24 : vector<8x128xf32>
    %245 = math.tanh %244 : vector<8x128xf32>
    %246 = arith.mulf %245, %24 : vector<8x128xf32>
    %247 = arith.addf %246, %27 : vector<8x128xf32>
    %248 = vector.extract_strided_slice %247 {offsets = [0, 0], sizes = [8, 32], strides = [1, 1]} : vector<8x128xf32> to vector<8x32xf32>
    %249 = vector.extract_strided_slice %247 {offsets = [0, 32], sizes = [8, 32], strides = [1, 1]} : vector<8x128xf32> to vector<8x32xf32>
    %250 = vector.extract_strided_slice %247 {offsets = [0, 64], sizes = [8, 32], strides = [1, 1]} : vector<8x128xf32> to vector<8x32xf32>
    %251 = vector.extract_strided_slice %247 {offsets = [0, 96], sizes = [8, 32], strides = [1, 1]} : vector<8x128xf32> to vector<8x32xf32>
    %252 = arith.mulf %249, %216 : vector<8x32xf32>
    %253 = arith.mulf %248, %250 : vector<8x32xf32>
    %254 = arith.addf %252, %253 : vector<8x32xf32>
    %255 = math.tanh %254 : vector<8x32xf32>
    %256 = arith.mulf %251, %255 : vector<8x32xf32>
    %257 = arith.select %241, %256, %215 : vector<8x32xi1>, vector<8x32xf32>
    %258 = arith.select %241, %254, %216 : vector<8x32xi1>, vector<8x32xf32>
    %259 = arith.truncf %257 : vector<8x32xf32> to vector<8x32xbf16>
    %cst_27 = arith.constant dense<0.000000e+00> : vector<8x256xf32>
    %260 = tpu.matmul %259, %9, %cst_27 {dimension_numbers = #tpu.dot_dimension_numbers<[1], [0], [0], [1], [0, 0, 1, 1], [], []>} : vector<8x32xbf16>, vector<32x256xbf16>, vector<8x256xf32> -> vector<8x256xf32>
    %261 = vector.extract_strided_slice %260 {offsets = [0, 0], sizes = [8, 128], strides = [1, 1]} : vector<8x256xf32> to vector<8x128xf32>
    %262 = arith.addf %261, %239 : vector<8x128xf32>
    %263 = vector.extract_strided_slice %260 {offsets = [0, 128], sizes = [8, 128], strides = [1, 1]} : vector<8x256xf32> to vector<8x128xf32>
    %264 = arith.mulf %262, %24 : vector<8x128xf32>
    %265 = math.tanh %264 : vector<8x128xf32>
    %266 = arith.mulf %265, %24 : vector<8x128xf32>
    %267 = arith.addf %266, %27 : vector<8x128xf32>
    %268 = vector.extract_strided_slice %267 {offsets = [0, 0], sizes = [8, 32], strides = [1, 1]} : vector<8x128xf32> to vector<8x32xf32>
    %269 = vector.extract_strided_slice %267 {offsets = [0, 32], sizes = [8, 32], strides = [1, 1]} : vector<8x128xf32> to vector<8x32xf32>
    %270 = vector.extract_strided_slice %267 {offsets = [0, 64], sizes = [8, 32], strides = [1, 1]} : vector<8x128xf32> to vector<8x32xf32>
    %271 = vector.extract_strided_slice %267 {offsets = [0, 96], sizes = [8, 32], strides = [1, 1]} : vector<8x128xf32> to vector<8x32xf32>
    %272 = arith.mulf %269, %236 : vector<8x32xf32>
    %273 = arith.mulf %268, %270 : vector<8x32xf32>
    %274 = arith.addf %272, %273 : vector<8x32xf32>
    %275 = math.tanh %274 : vector<8x32xf32>
    %276 = arith.mulf %271, %275 : vector<8x32xf32>
    %277 = arith.select %241, %276, %235 : vector<8x32xi1>, vector<8x32xf32>
    %278 = arith.select %241, %274, %236 : vector<8x32xi1>, vector<8x32xf32>
    %279 = arith.truncf %277 : vector<8x32xf32> to vector<8x32xbf16>
    %cst_28 = arith.constant dense<0.000000e+00> : vector<8x128xf32>
    %280 = tpu.matmul %279, %10, %cst_28 {dimension_numbers = #tpu.dot_dimension_numbers<[1], [0], [0], [1], [0, 0, 1, 1], [], []>} : vector<8x32xbf16>, vector<32x128xbf16>, vector<8x128xf32> -> vector<8x128xf32>
    %281 = arith.addf %280, %13 : vector<8x128xf32>
    %c6_i32 = arith.constant 6 : i32
    %282 = vector.broadcast %c6_i32 : i32 to vector<8x32xi32>
    %283 = arith.cmpi sgt, %15, %282 : vector<8x32xi32>
    %284 = vector.extract_strided_slice %8 {offsets = [48, 0], sizes = [8, 128], strides = [1, 1]} : vector<64x128xf32> to vector<8x128xf32>
    %285 = arith.addf %284, %263 : vector<8x128xf32>
    %286 = arith.mulf %285, %24 : vector<8x128xf32>
    %287 = math.tanh %286 : vector<8x128xf32>
    %288 = arith.mulf %287, %24 : vector<8x128xf32>
    %289 = arith.addf %288, %27 : vector<8x128xf32>
    %290 = vector.extract_strided_slice %289 {offsets = [0, 0], sizes = [8, 32], strides = [1, 1]} : vector<8x128xf32> to vector<8x32xf32>
    %291 = vector.extract_strided_slice %289 {offsets = [0, 32], sizes = [8, 32], strides = [1, 1]} : vector<8x128xf32> to vector<8x32xf32>
    %292 = vector.extract_strided_slice %289 {offsets = [0, 64], sizes = [8, 32], strides = [1, 1]} : vector<8x128xf32> to vector<8x32xf32>
    %293 = vector.extract_strided_slice %289 {offsets = [0, 96], sizes = [8, 32], strides = [1, 1]} : vector<8x128xf32> to vector<8x32xf32>
    %294 = arith.mulf %291, %258 : vector<8x32xf32>
    %295 = arith.mulf %290, %292 : vector<8x32xf32>
    %296 = arith.addf %294, %295 : vector<8x32xf32>
    %297 = math.tanh %296 : vector<8x32xf32>
    %298 = arith.mulf %293, %297 : vector<8x32xf32>
    %299 = arith.select %283, %298, %257 : vector<8x32xi1>, vector<8x32xf32>
    %300 = arith.select %283, %296, %258 : vector<8x32xi1>, vector<8x32xf32>
    %301 = arith.truncf %299 : vector<8x32xf32> to vector<8x32xbf16>
    %cst_29 = arith.constant dense<0.000000e+00> : vector<8x256xf32>
    %302 = tpu.matmul %301, %9, %cst_29 {dimension_numbers = #tpu.dot_dimension_numbers<[1], [0], [0], [1], [0, 0, 1, 1], [], []>} : vector<8x32xbf16>, vector<32x256xbf16>, vector<8x256xf32> -> vector<8x256xf32>
    %303 = vector.extract_strided_slice %302 {offsets = [0, 0], sizes = [8, 128], strides = [1, 1]} : vector<8x256xf32> to vector<8x128xf32>
    %304 = arith.addf %303, %281 : vector<8x128xf32>
    %305 = vector.extract_strided_slice %302 {offsets = [0, 128], sizes = [8, 128], strides = [1, 1]} : vector<8x256xf32> to vector<8x128xf32>
    %306 = arith.mulf %304, %24 : vector<8x128xf32>
    %307 = math.tanh %306 : vector<8x128xf32>
    %308 = arith.mulf %307, %24 : vector<8x128xf32>
    %309 = arith.addf %308, %27 : vector<8x128xf32>
    %310 = vector.extract_strided_slice %309 {offsets = [0, 0], sizes = [8, 32], strides = [1, 1]} : vector<8x128xf32> to vector<8x32xf32>
    %311 = vector.extract_strided_slice %309 {offsets = [0, 32], sizes = [8, 32], strides = [1, 1]} : vector<8x128xf32> to vector<8x32xf32>
    %312 = vector.extract_strided_slice %309 {offsets = [0, 64], sizes = [8, 32], strides = [1, 1]} : vector<8x128xf32> to vector<8x32xf32>
    %313 = vector.extract_strided_slice %309 {offsets = [0, 96], sizes = [8, 32], strides = [1, 1]} : vector<8x128xf32> to vector<8x32xf32>
    %314 = arith.mulf %311, %278 : vector<8x32xf32>
    %315 = arith.mulf %310, %312 : vector<8x32xf32>
    %316 = arith.addf %314, %315 : vector<8x32xf32>
    %317 = math.tanh %316 : vector<8x32xf32>
    %318 = arith.mulf %313, %317 : vector<8x32xf32>
    %319 = arith.select %283, %318, %277 : vector<8x32xi1>, vector<8x32xf32>
    %320 = arith.select %283, %316, %278 : vector<8x32xi1>, vector<8x32xf32>
    %321 = arith.truncf %319 : vector<8x32xf32> to vector<8x32xbf16>
    %cst_30 = arith.constant dense<0.000000e+00> : vector<8x128xf32>
    %322 = tpu.matmul %321, %10, %cst_30 {dimension_numbers = #tpu.dot_dimension_numbers<[1], [0], [0], [1], [0, 0, 1, 1], [], []>} : vector<8x32xbf16>, vector<32x128xbf16>, vector<8x128xf32> -> vector<8x128xf32>
    %323 = arith.addf %322, %13 : vector<8x128xf32>
    %c7_i32 = arith.constant 7 : i32
    %324 = vector.broadcast %c7_i32 : i32 to vector<8x32xi32>
    %325 = arith.cmpi sgt, %15, %324 : vector<8x32xi32>
    %326 = vector.extract_strided_slice %8 {offsets = [56, 0], sizes = [8, 128], strides = [1, 1]} : vector<64x128xf32> to vector<8x128xf32>
    %327 = arith.addf %326, %305 : vector<8x128xf32>
    %328 = arith.mulf %327, %24 : vector<8x128xf32>
    %329 = math.tanh %328 : vector<8x128xf32>
    %330 = arith.mulf %329, %24 : vector<8x128xf32>
    %331 = arith.addf %330, %27 : vector<8x128xf32>
    %332 = vector.extract_strided_slice %331 {offsets = [0, 0], sizes = [8, 32], strides = [1, 1]} : vector<8x128xf32> to vector<8x32xf32>
    %333 = vector.extract_strided_slice %331 {offsets = [0, 32], sizes = [8, 32], strides = [1, 1]} : vector<8x128xf32> to vector<8x32xf32>
    %334 = vector.extract_strided_slice %331 {offsets = [0, 64], sizes = [8, 32], strides = [1, 1]} : vector<8x128xf32> to vector<8x32xf32>
    %335 = vector.extract_strided_slice %331 {offsets = [0, 96], sizes = [8, 32], strides = [1, 1]} : vector<8x128xf32> to vector<8x32xf32>
    %336 = arith.mulf %333, %300 : vector<8x32xf32>
    %337 = arith.mulf %332, %334 : vector<8x32xf32>
    %338 = arith.addf %336, %337 : vector<8x32xf32>
    %339 = math.tanh %338 : vector<8x32xf32>
    %340 = arith.mulf %335, %339 : vector<8x32xf32>
    %341 = arith.select %325, %340, %299 : vector<8x32xi1>, vector<8x32xf32>
    %342 = arith.truncf %341 : vector<8x32xf32> to vector<8x32xbf16>
    %343 = vector.extract_strided_slice %9 {offsets = [0, 0], sizes = [32, 128], strides = [1, 1]} : vector<32x256xbf16> to vector<32x128xbf16>
    %cst_31 = arith.constant dense<0.000000e+00> : vector<8x128xf32>
    %344 = tpu.matmul %342, %343, %cst_31 {dimension_numbers = #tpu.dot_dimension_numbers<[1], [0], [0], [1], [0, 0, 1, 1], [], []>} : vector<8x32xbf16>, vector<32x128xbf16>, vector<8x128xf32> -> vector<8x128xf32>
    %345 = arith.addf %344, %323 : vector<8x128xf32>
    %346 = arith.mulf %345, %24 : vector<8x128xf32>
    %347 = math.tanh %346 : vector<8x128xf32>
    %348 = arith.mulf %347, %24 : vector<8x128xf32>
    %349 = arith.addf %348, %27 : vector<8x128xf32>
    %350 = vector.extract_strided_slice %349 {offsets = [0, 0], sizes = [8, 32], strides = [1, 1]} : vector<8x128xf32> to vector<8x32xf32>
    %351 = vector.extract_strided_slice %349 {offsets = [0, 32], sizes = [8, 32], strides = [1, 1]} : vector<8x128xf32> to vector<8x32xf32>
    %352 = vector.extract_strided_slice %349 {offsets = [0, 64], sizes = [8, 32], strides = [1, 1]} : vector<8x128xf32> to vector<8x32xf32>
    %353 = vector.extract_strided_slice %349 {offsets = [0, 96], sizes = [8, 32], strides = [1, 1]} : vector<8x128xf32> to vector<8x32xf32>
    %354 = arith.mulf %351, %320 : vector<8x32xf32>
    %355 = arith.mulf %350, %352 : vector<8x32xf32>
    %356 = arith.addf %354, %355 : vector<8x32xf32>
    %357 = math.tanh %356 : vector<8x32xf32>
    %358 = arith.mulf %353, %357 : vector<8x32xf32>
    %359 = arith.select %325, %358, %319 : vector<8x32xi1>, vector<8x32xf32>
    %c0_32 = arith.constant 0 : index
    %c0_33 = arith.constant 0 : index
    %360 = vector.load %arg6[%c0_32, %c0_33] : memref<32x128xf32, #tpu.memory_space<vmem>>, vector<32x128xf32>
    %cst_34 = arith.constant dense<0.000000e+00> : vector<8x128xf32>
    %361 = tpu.matmul %359, %360, %cst_34 {dimension_numbers = #tpu.dot_dimension_numbers<[1], [0], [0], [1], [0, 0, 1, 1], [], []>} : vector<8x32xf32>, vector<32x128xf32>, vector<8x128xf32> -> vector<8x128xf32>
    %c0_35 = arith.constant 0 : index
    %c0_36 = arith.constant 0 : index
    %362 = vector.load %arg7[%c0_35, %c0_36] : memref<1x128xf32, #tpu.memory_space<vmem>>, vector<1x128xf32>
    %363 = vector.broadcast %362 : vector<1x128xf32> to vector<8x128xf32>
    %364 = arith.addf %361, %363 : vector<8x128xf32>
    %c0_37 = arith.constant 0 : index
    %c0_38 = arith.constant 0 : index
    %365 = vector.load %arg8[%c0_37, %c0_38] : memref<8x128xf32, #tpu.memory_space<vmem>>, vector<8x128xf32>
    tpu.vector_store %arg8[%c0_37, %c0_38], %364 {strides = array<i32>} : memref<8x128xf32, #tpu.memory_space<vmem>>, vector<8x128xf32>,
    return
  }
}

</mosaic_0001>

<bundles_post_ra>
// kernel: lstm_packed_forward.1
= control target key start
LH: loop header
LB: loop body
LE: loop exit
PB: predicated region body
PF: predicated region fallthrough
CT: control target
= control target key end

     0   :  { %v1738_v0 = vmov 0   ;;  %v39_v7 = vlaneseq  ;;  %vm91_vm0 = vcmask 130048   ;;  %v1739_v10 = vmov 0.0   ;;  %s2367_s0 = inlined_call_operand.vmem [shape: s32[64,1], index: 0, kind: input, shape index: {}]   ;;  %s2368_s2 = inlined_call_operand.vmem [shape: f32[16,128], index: 2, kind: input, shape index: {}]   ;;  %s2369_s1 = inlined_call_operand.vmem [shape: s32[8,1], index: 1, kind: input, shape index: {}]   ;;  %s2370_s3 = inlined_call_operand.vmem [shape: bf16[32,256], index: 3, kind: input, shape index: {}]   ;;  %s2371_s5 = inlined_call_operand.vmem [shape: f32[1,128], index: 5, kind: input, shape index: {}]   ;;  %s2372_s4 = inlined_call_operand.vmem [shape: bf16[32,128], index: 4, kind: input, shape index: {}]   ;;  %s2373_s6 = inlined_call_operand.vmem [shape: f32[32,128], index: 6, kind: input, shape index: {}]   ;;  %s2374_s7 = inlined_call_operand.vmem [shape: f32[1,128], index: 7, kind: input, shape index: {}]   ;;  %s2375_s8 = inlined_call_operand.vmem [shape: f32[8,128], index: 8, kind: output, shape index: {}]  }
   0x1   :  { %1661 = vset.pattern.permute.xlu0 %v1738_v0  ;;  %v31_v1 = vld [vmem:[%s2367_s0] sm:$0xff]  ;;  %329 = vmatprep.mubr.bf16.mxu1 %v1738_v0  ;;  %v90_v3 = vld [vmem:[%s2368_s2 + $0x8] sm:$0xff]  ;;  %v1740_v14 = vmov 0.5   ;;  %v1840_v30 = vld [vmem:[%s2370_s3 + $0x14] ss:$8 sps:$4 sm:$0xff]   ;;  %vm293_vm7 = vcmask 261120  }
   0x2   :  { %42 = vperm.xlu0 %1661, %v31_v1   ;;  %v89_v2 = vld [vmem:[%s2368_s2] sm:$0xff]  ;;  %1662 = vset.pattern.permute.xlu1 %v1738_v0  ;;  %v32_v4 = vld [vmem:[%s2367_s0 + $0x8] sm:$0xff]  ;;  %v1808_v8 = vand.u32 127, %v39_v7  ;;  %s1742_s2 = smov 32   ;;  %v1848_v31 = vld [vmem:[%s2370_s3 + $0x10] ss:$8 sps:$4 sm:$0xff]  }
   0x3   :  { %v1639_v5 = vpack.c.bf16 %v90_v3, %v89_v2  ;;  %v30_v6 = vld [vmem:[%s2369_s1] sm:$0xff]  ;;  %s1741_s1 = smov 64   ;;  %v36_v7 = vld [vmem:[%s2367_s0 + $0x28] sm:$0xff]  ;;  %vm1743_vm8 = vmmov 0  }
   0x4   :  { %vm239_vm3 = vcmp.ge.s32.totalorder %v1808_v8, 64  ;;  %vm240_vm4 = vcmp.lt.s32.totalorder %v1808_v8, 96  ;;  %v1830_v28 = vld [vmem:[%s2370_s3] ss:$8 sps:$4 sm:$0xff]   ;;  %v1835_v29 = vld [vmem:[%s2370_s3 + $0x4] ss:$8 sps:$4 sm:$0xff]  }
   0x5   :  { %1640 = vmatprep.subr.bf16.mxu0 %v1639_v5  ;;  %vm241_vm5 = vmand %vm239_vm3, %vm240_vm4  ;;  %297 = vmatprep.subr.bf16.mxu1 %v1835_v29  ;;  %v1872_v39 = vld [vmem:[%s2371_s5] ss:$0 sm:$0xff] }
   0x6   :  { %45 = vperm.xlu0 %1661, %v32_v4   ;;  %1642 = vmatpush3.bf16.msra.mxu0 %v1639_v5  ;;  %v1818_v15 = vsel %vm241_vm5, 1.0, %v1740_v14  ;;  %v1821_v20 = vsel %vm241_vm5, 0.0, %v1740_v14  ;;  %v33_v4 = vld [vmem:[%s2367_s0 + $0x10] sm:$0xff]  ;;  %v34_v5 = vld [vmem:[%s2367_s0 + $0x18] sm:$0xff] }
   0x7   :  { %453 = vmatprep.subr.bf16.mxu0 %v1835_v29  ;;  %298 = vmatpush1.bf16.msra.mxu1 %v1830_v28 }
   0x8   :  { %299 = vmatprep.subr.bf16.mxu1 %v1840_v30 }
   0xa   :  { %237 = vperm.xlu0 %1661, %v30_v6   ;;  %v35_v6 = vld [vmem:[%s2367_s0 + $0x20] sm:$0xff] }
   0xb   :  { %300 = vmatpush1.bf16.msra.mxu1 %v1848_v31 }
   0xc   :  { %1564 = vmatprep.subr.bf16.mxu1 %v1739_v10 }
  0x81   :  { %v43_v9 = vpop.permute.xlu0 %42 }
  0x82   :  { %vm65_vm1 = vcmp.eq.s32.totalorder %v1808_v8, %v43_v9  ;;  %v37_v9 = vld [vmem:[%s2367_s0 + $0x30] sm:$0xff] }
  0x83   :  { %v1469_v11 = vsel %vm65_vm1, 1.0, %v1739_v10 }
  0x84   :  { %1552 = vmatprep.mubr.msk.f32.mxu0 %vm91_vm0, %v1469_v11  ;;  %v38_v11 = vld [vmem:[%s2367_s0 + $0x38] sm:$0xff] }
  0x85   :  { %v46_v12 = vpop.permute.xlu0 %45 }
  0x86   :  { %vm66_vm2 = vcmp.eq.s32.totalorder %v1808_v8, %v46_v12  ;;  %v1919_v12 = vld [vmem:[%s2372_s4] sm:$0xff]  }
  0x87   :  { %v1470_v13 = vsel %vm66_vm2, 1.0, %v1739_v10 }
  0x88   :  { %1553 = vmatmul.mubr.msk.f32.vlgmr.msra.gmra.mrb[0].mxu0 %vm91_vm0, %v1470_v13  ;;  %v1927_v13 = vld [vmem:[%s2372_s4 + $0x8] sm:$0xff]  }
  0x89   :  { %454 = vmatpush1.bf16.msra.mxu0 %v1830_v28  ;;  %v1858_v33 = vpop.permute.xlu0 %237 }
  0x8a   :  { %455 = vmatprep.subr.bf16.mxu0 %v1840_v30  ;;  %vm244_vm6 = vcmp.gt.s32.totalorder %v1858_v33, 0  ;;  %vm421_vm9 = vcmp.gt.s32.totalorder %v1858_v33, 1  ;;  %vm709_vm1 = vcmp.gt.s32.totalorder %v1858_v33, 3  ;;  %vm853_vm2 = vcmp.gt.s32.totalorder %v1858_v33, 4 }
  0x8b   :  { %vm997_vm3 = vcmp.gt.s32.totalorder %v1858_v33, 5  ;;  %vm1141_vm4 = vcmp.gt.s32.totalorder %v1858_v33, 6  ;;  %vm1285_vm5 = vcmp.gt.s32.totalorder %v1858_v33, 7 }
  0x8d   :  { %456 = vmatpush1.bf16.msra.mxu0 %v1848_v31 }
  0x8e   :  { %597 = vmatprep.subr.bf16.mxu0 %v1835_v29 }
 0x15b   :  { %v1554_v16 = vpop.f32.mrb[0].mxu0 }
 0x15c   :  { %v182_v17 = vpop.f32.mrb[1].mxu0 }
 0x15d   :  { %v246_v18 = vmul.f32 %v1818_v15, %v182_v17 }
 0x15f   :  { %1671 = vtanh.f32 %v246_v18 }
 0x169   :  { %v1672_v19 = vpop.eup %1671 }
 0x16a   :  { %v248_v21 = vmul.f32 %v1672_v19, %v1818_v15 }
 0x16c   :  { %v249_v22 = vadd.f32 %v248_v21, %v1821_v20 }
 0x16e   :  { %252 = vrot.lane.b32.xlu1 %v249_v22, %s1741_s1  ;;  %v250_v25 = vmul.f32 0.0, %v249_v22 }
 0x1e0   :  { %v253_v23 = vpop.permute.xlu1 %252 }
 0x1e1   :  { %v255_v24 = vmul.f32 %v253_v23, %v249_v22 }
 0x1e3   :  { %257 = vrot.lane.b32.xlu1 %v255_v24, %s1742_s2 }
 0x255   :  { %v258_v26 = vpop.permute.xlu1 %257 }
 0x256   :  { %v260_v27 = vadd.f32 %v258_v26, %v250_v25 }
 0x258   :  { %1673 = vtanh.f32 %v260_v27  ;;  %v1887_v58 = vsel %vm244_vm6, %v260_v27, 0.0 }
 0x262   :  { %v1674_v32 = vpop.eup %1673 }
 0x263   :  { %263 = vrot.lane.b32.xlu1 %v1674_v32, %s1741_s1 }
 0x2d5   :  { %v264_v34 = vpop.permute.xlu1 %263 }
 0x2d6   :  { %v266_v35 = vmul.f32 %v264_v34, %v249_v22 }
 0x2d8   :  { %v1863_v36 = vsel %vm244_vm6, %v266_v35, 0.0 }
 0x2d9   :  { %v269_v37 = vpack.c.bf16 %v1863_v36, %v1863_v36 }
 0x2db   :  { %271 = vrot.lane.b32.xlu0 %v269_v37, %s1742_s2 }
 0x34d   :  { %v272_v38 = vpop.permute.xlu0 %271 }
 0x34e   :  { %1490 = vmatmul.mubr.msk.bf16.vlgmr.msra.gmra.mrb[0].mxu1 %vm293_vm7, %v272_v38 }
 0x34f   :  { %1568 = vmatprep.mubr.msk.bf16.mxu1 %vm1743_vm8, %v1739_v10  ;;  %1565 = vmatpush3.bf16.msra.mxu1 %v1919_v12 }
 0x350   :  { %1566 = vmatprep.subr.bf16.mxu1 %v1739_v10 }
 0x353   :  { %1567 = vmatpush3.bf16.msra.mxu1 %v1927_v13 }
 0x354   :  { %1572 = vmatprep.subr.bf16.mxu1 %v1739_v10 }
 0x421   :  { %v331_v40 = vpop.f32.mrb[0].mxu1 }
 0x422   :  { %v338_v41 = vadd.f32 %v1872_v39, %v331_v40  ;;  %v333_v42 = vpop.f32.mrb[1].mxu1 }
 0x423   :  { %v422_v43 = vadd.f32 %v1554_v16, %v333_v42  ;;  %v335_v44 = vpop.f32.mrb[2].mxu1 }
 0x424   :  { %v339_v45 = vmul.f32 %v338_v41, %v1818_v15  ;;  %v336_v46 = vpop.f32.mrb[3].mxu1 }
 0x425   :  { %v423_v47 = vmul.f32 %v422_v43, %v1818_v15 }
 0x426   :  { %1675 = vtanh.f32 %v339_v45 }
 0x427   :  { %1677 = vtanh.f32 %v423_v47 }
 0x430   :  { %v1676_v48 = vpop.eup %1675 }
 0x431   :  { %v1678_v49 = vpop.eup %1677  ;;  %v341_v50 = vmul.f32 %v1676_v48, %v1818_v15 }
 0x432   :  { %v425_v51 = vmul.f32 %v1678_v49, %v1818_v15 }
 0x433   :  { %v342_v52 = vadd.f32 %v341_v50, %v1821_v20 }
 0x434   :  { %v426_v53 = vadd.f32 %v425_v51, %v1821_v20 }
 0x435   :  { %345 = vrot.lane.b32.xlu1 %v342_v52, %s1741_s1  ;;  %v343_v59 = vmul.f32 0.0, %v342_v52 }
 0x436   :  { %429 = vrot.lane.b32.xlu0 %v426_v53, %s1741_s1  ;;  %v427_v61 = vmul.f32 %v426_v53, %v1887_v58 }
 0x4a7   :  { %v346_v54 = vpop.permute.xlu1 %345 }
 0x4a8   :  { %v348_v55 = vmul.f32 %v346_v54, %v342_v52  ;;  %v430_v56 = vpop.permute.xlu0 %429 }
 0x4a9   :  { %v432_v57 = vmul.f32 %v430_v56, %v426_v53 }
 0x4aa   :  { %350 = vrot.lane.b32.xlu1 %v348_v55, %s1742_s2 }
 0x4ab   :  { %434 = vrot.lane.b32.xlu0 %v432_v57, %s1742_s2 }
 0x51c   :  { %v351_v60 = vpop.permute.xlu1 %350 }
 0x51d   :  { %v1890_v62 = vadd.f32 %v351_v60, %v343_v59  ;;  %v435_v63 = vpop.permute.xlu0 %434 }
 0x51e   :  { %v1892_v1 = vadd.f32 %v435_v63, %v427_v61 }
 0x51f   :  { %1679 = vtanh.f32 %v1890_v62 }
 0x520   :  { %1681 = vtanh.f32 %v1892_v1 }
 0x529   :  { %v1680_v2 = vpop.eup %1679 }
 0x52a   :  { %v1682_v3 = vpop.eup %1681  ;;  %356 = vrot.lane.b32.xlu1 %v1680_v2, %s1741_s1 }
 0x52b   :  { %440 = vrot.lane.b32.xlu0 %v1682_v3, %s1741_s1 }
 0x52e   :  { %48 = vperm.xlu1 %1662, %v33_v4  }
 0x52f   :  { %51 = vperm.xlu0 %1661, %v34_v5  }
 0x532   :  { %54 = vperm.xlu1 %1662, %v35_v6  }
 0x533   :  { %57 = vperm.xlu0 %1661, %v36_v7  }
 0x536   :  { %60 = vperm.xlu1 %1662, %v37_v9  }
 0x537   :  { %63 = vperm.xlu0 %1661, %v38_v11  }
 0x59c   :  { %v357_v14 = vpop.permute.xlu1 %356 }
 0x59d   :  { %v359_v16 = vmul.f32 %v357_v14, %v342_v52  ;;  %v441_v17 = vpop.permute.xlu0 %440 }
 0x59e   :  { %v443_v18 = vmul.f32 %v441_v17, %v426_v53  ;;  %v2004_v17 = vsel %vm244_vm6, %v1890_v62, 0.0 }
 0x59f   :  { %v1934_v19 = vsel %vm244_vm6, %v359_v16, 0.0 }
 0x5a0   :  { %v362_v21 = vpack.c.bf16 %v1934_v19, %v1934_v19  ;;  %v1942_v22 = vsel %vm421_vm9, %v443_v18, %v1863_v36  ;;  %v2010_v18 = vsel %vm421_vm9, %v1892_v1, %v1887_v58 }
 0x5a1   :  { %v446_v23 = vpack.c.bf16 %v1942_v22, %v1942_v22 }
 0x5a2   :  { %364 = vrot.lane.b32.xlu1 %v362_v21, %s1742_s2 }
 0x5a3   :  { %448 = vrot.lane.b32.xlu0 %v446_v23, %s1742_s2 }
 0x5ad   :  { %v49_v24 = vpop.permute.xlu1 %48 }
 0x5ae   :  { %vm67_vm10 = vcmp.eq.s32.totalorder %v1808_v8, %v49_v24  ;;  %v52_v25 = vpop.permute.xlu0 %51 }
 0x5af   :  { %v1471_v26 = vsel %vm67_vm10, 1.0, %v1739_v10  ;;  %vm68_vm11 = vcmp.eq.s32.totalorder %v1808_v8, %v52_v25 }
 0x5b0   :  { %v1472_v27 = vsel %vm68_vm11, 1.0, %v1739_v10  ;;  %1555 = vmatprep.mubr.msk.f32.mxu0 %vm91_vm0, %v1471_v26 }
 0x5b1   :  { %v55_v32 = vpop.permute.xlu1 %54  ;;  %1556 = vmatmul.mubr.msk.f32.gmra.mrb[2].mxu0 %vm91_vm0, %v1472_v27 }
 0x5b2   :  { %vm69_vm12 = vcmp.eq.s32.totalorder %v1808_v8, %v55_v32  ;;  %v58_v34 = vpop.permute.xlu0 %57 }
 0x5b3   :  { %v1473_v35 = vsel %vm69_vm12, 1.0, %v1739_v10  ;;  %vm70_vm13 = vcmp.eq.s32.totalorder %v1808_v8, %v58_v34 }
 0x5b4   :  { %v1474_v36 = vsel %vm70_vm13, 1.0, %v1739_v10  ;;  %1558 = vmatprep.mubr.msk.f32.mxu0 %vm91_vm0, %v1473_v35 }
 0x5b5   :  { %v61_v37 = vpop.permute.xlu1 %60  ;;  %1559 = vmatmul.mubr.msk.f32.gmra.mrb[4].mxu0 %vm91_vm0, %v1474_v36 }
 0x5b6   :  { %vm71_vm14 = vcmp.eq.s32.totalorder %v1808_v8, %v61_v37  ;;  %v64_v38 = vpop.permute.xlu0 %63 }
 0x5b7   :  { %v1475_v40 = vsel %vm71_vm14, 1.0, %v1739_v10  ;;  %vm72_vm15 = vcmp.eq.s32.totalorder %v1808_v8, %v64_v38 }
 0x5b8   :  { %v1476_v41 = vsel %vm72_vm15, 1.0, %v1739_v10  ;;  %1561 = vmatprep.mubr.msk.f32.mxu0 %vm91_vm0, %v1475_v40 }
 0x5b9   :  { %1562 = vmatmul.mubr.msk.f32.gmra.mrb[6].mxu0 %vm91_vm0, %v1476_v41  ;;  %vm565_vm0 = vcmp.gt.s32.totalorder %v1858_v33, 2 }
 0x5ba   :  { %485 = vmatprep.mubr.bf16.mxu0 %v1738_v0 }
 0x614   :  { %v365_v42 = vpop.permute.xlu1 %364 }
 0x615   :  { %1569 = vmatmul.mubr.msk.bf16.vlgmr.msra.gmra.mrb[4].mxu1 %vm293_vm7, %v365_v42  ;;  %v449_v43 = vpop.permute.xlu0 %448 }
 0x616   :  { %1494 = vmatmul.mubr.msk.bf16.vlgmr.msra.gmra.mrb[8].mxu0 %vm293_vm7, %v449_v43  ;;  %1573 = vmatpush3.bf16.msra.mxu1 %v1919_v12 }
 0x617   :  { %598 = vmatpush1.bf16.msra.mxu0 %v1830_v28  ;;  %1574 = vmatprep.subr.bf16.mxu1 %v1739_v10 }
 0x618   :  { %599 = vmatprep.subr.bf16.mxu0 %v1840_v30  ;;  %1576 = vmatprep.mubr.msk.bf16.mxu1 %vm1743_vm8, %v1739_v10 }
 0x619   :  { %629 = vmatprep.mubr.bf16.mxu0 %v1738_v0 }
 0x61a   :  { %1575 = vmatpush3.bf16.msra.mxu1 %v1927_v13 }
 0x61b   :  { %600 = vmatpush1.bf16.msra.mxu0 %v1848_v31  ;;  %1580 = vmatprep.subr.bf16.mxu1 %v1739_v10 }
 0x61c   :  { %741 = vmatprep.subr.bf16.mxu0 %v1835_v29 }
 0x684   :  { %v1980_v8 = vpop.f32.mrb[2].mxu0 }
 0x685   :  { %v192_v44 = vpop.f32.mrb[3].mxu0 }
 0x688   :  { %v1982_v45 = vpop.f32.mrb[4].mxu0 }
 0x689   :  { %v1984_v46 = vpop.f32.mrb[5].mxu0 }
 0x68c   :  { %v1986_v47 = vpop.f32.mrb[6].mxu0 }
 0x68d   :  { %v1988_v48 = vpop.f32.mrb[7].mxu0 }
 0x6e8   :  { %v415_v49 = vpop.f32.mrb[4].mxu1 }
 0x6e9   :  { %v416_v50 = vadd.f32 %v1872_v39, %v415_v49  ;;  %v1570_v51 = vpop.f32.mrb[5].mxu1  ;;  %v487_v52 = vpop.f32.mrb[8].mxu0 }
 0x6ea   :  { %v418_v53 = vpop.f32.mrb[6].mxu1  ;;  %v489_v54 = vpop.f32.mrb[9].mxu0 }
 0x6eb   :  { %v494_v55 = vadd.f32 %v487_v52, %v416_v50  ;;  %v566_v56 = vadd.f32 %v489_v54, %v192_v44  ;;  %v1571_v57 = vpop.f32.mrb[7].mxu1  ;;  %v491_v59 = vpop.f32.mrb[10].mxu0 }
 0x6ec   :  { %v492_v60 = vpop.f32.mrb[11].mxu0 }
 0x6ed   :  { %v495_v61 = vmul.f32 %v494_v55, %v1818_v15  ;;  %v567_v63 = vmul.f32 %v566_v56, %v1818_v15 }
 0x6ef   :  { %1683 = vtanh.f32 %v495_v61 }
 0x6f0   :  { %1685 = vtanh.f32 %v567_v63 }
 0x6f9   :  { %v1684_v2 = vpop.eup %1683 }
 0x6fa   :  { %v1686_v3 = vpop.eup %1685  ;;  %v497_v4 = vmul.f32 %v1684_v2, %v1818_v15 }
 0x6fb   :  { %v569_v5 = vmul.f32 %v1686_v3, %v1818_v15 }
 0x6fc   :  { %v498_v6 = vadd.f32 %v497_v4, %v1821_v20 }
 0x6fd   :  { %v570_v7 = vadd.f32 %v569_v5, %v1821_v20 }
 0x6fe   :  { %501 = vrot.lane.b32.xlu1 %v498_v6, %s1741_s1  ;;  %v499_v21 = vmul.f32 %v498_v6, %v2004_v17 }
 0x6ff   :  { %573 = vrot.lane.b32.xlu0 %v570_v7, %s1741_s1  ;;  %v571_v23 = vmul.f32 %v570_v7, %v2010_v18 }
 0x770   :  { %v502_v9 = vpop.permute.xlu1 %501 }
 0x771   :  { %v574_v11 = vpop.permute.xlu0 %573  ;;  %v504_v14 = vmul.f32 %v502_v9, %v498_v6 }
 0x772   :  { %v576_v16 = vmul.f32 %v574_v11, %v570_v7 }
 0x773   :  { %506 = vrot.lane.b32.xlu1 %v504_v14, %s1742_s2 }
 0x774   :  { %578 = vrot.lane.b32.xlu0 %v576_v16, %s1742_s2 }
 0x7e5   :  { %v507_v24 = vpop.permute.xlu1 %506 }
 0x7e6   :  { %v579_v25 = vpop.permute.xlu0 %578  ;;  %v2014_v26 = vadd.f32 %v507_v24, %v499_v21 }
 0x7e7   :  { %v2016_v27 = vadd.f32 %v579_v25, %v571_v23 }
 0x7e8   :  { %1687 = vtanh.f32 %v2014_v26 }
 0x7e9   :  { %1689 = vtanh.f32 %v2016_v27  ;;  %v2074_v9 = vsel %vm565_vm0, %v2016_v27, %v2010_v18 }
 0x7f2   :  { %v1688_v62 = vpop.eup %1687 }
 0x7f3   :  { %v1690_v32 = vpop.eup %1689  ;;  %512 = vrot.lane.b32.xlu1 %v1688_v62, %s1741_s1 }
 0x7f4   :  { %584 = vrot.lane.b32.xlu0 %v1690_v32, %s1741_s1 }
 0x865   :  { %v513_v58 = vpop.permute.xlu1 %512 }
 0x866   :  { %v585_v1 = vpop.permute.xlu0 %584  ;;  %v515_v34 = vmul.f32 %v513_v58, %v498_v6 }
 0x867   :  { %v587_v35 = vmul.f32 %v585_v1, %v570_v7  ;;  %v2068_v7 = vsel %vm421_vm9, %v2014_v26, %v2004_v17 }
 0x868   :  { %v2026_v36 = vsel %vm421_vm9, %v515_v34, %v1934_v19 }
 0x869   :  { %v2031_v37 = vsel %vm565_vm0, %v587_v35, %v1942_v22  ;;  %v518_v38 = vpack.c.bf16 %v2026_v36, %v2026_v36 }
 0x86a   :  { %v590_v40 = vpack.c.bf16 %v2031_v37, %v2031_v37 }
 0x86b   :  { %520 = vrot.lane.b32.xlu1 %v518_v38, %s1742_s2 }
 0x86c   :  { %592 = vrot.lane.b32.xlu0 %v590_v40, %s1742_s2 }
 0x8dd   :  { %v521_v41 = vpop.permute.xlu1 %520 }
 0x8de   :  { %v593_v42 = vpop.permute.xlu0 %592  ;;  %1577 = vmatmul.mubr.msk.bf16.vlgmr.msra.gmra.mrb[8].mxu1 %vm293_vm7, %v521_v41 }
 0x8df   :  { %1496 = vmatmul.mubr.msk.bf16.vlgmr.msra.gmra.mrb[12].mxu0 %vm293_vm7, %v593_v42  ;;  %1581 = vmatpush3.bf16.msra.mxu1 %v1919_v12 }
 0x8e0   :  { %742 = vmatpush1.bf16.msra.mxu0 %v1830_v28  ;;  %1582 = vmatprep.subr.bf16.mxu1 %v1739_v10 }
 0x8e1   :  { %743 = vmatprep.subr.bf16.mxu0 %v1840_v30  ;;  %773 = vmatprep.mubr.bf16.mxu0 %v1738_v0 }
 0x8e2   :  { %1584 = vmatprep.mubr.msk.bf16.mxu1 %vm1743_vm8, %v1739_v10 }
 0x8e3   :  { %1583 = vmatpush3.bf16.msra.mxu1 %v1927_v13 }
 0x8e4   :  { %744 = vmatpush1.bf16.msra.mxu0 %v1848_v31  ;;  %1588 = vmatprep.subr.bf16.mxu1 %v1739_v10 }
 0x8e5   :  { %885 = vmatprep.subr.bf16.mxu0 %v1835_v29 }
 0x9b1   :  { %v559_v19 = vpop.f32.mrb[8].mxu1 }
 0x9b2   :  { %v560_v22 = vadd.f32 %v1872_v39, %v559_v19  ;;  %v631_v43 = vpop.f32.mrb[12].mxu0  ;;  %v1578_v44 = vpop.f32.mrb[9].mxu1 }
 0x9b3   :  { %v633_v49 = vpop.f32.mrb[13].mxu0  ;;  %v562_v50 = vpop.f32.mrb[10].mxu1 }
 0x9b4   :  { %v638_v51 = vadd.f32 %v631_v43, %v560_v22  ;;  %v710_v52 = vadd.f32 %v1980_v8, %v633_v49  ;;  %v635_v53 = vpop.f32.mrb[14].mxu0  ;;  %v1579_v54 = vpop.f32.mrb[11].mxu1 }
 0x9b5   :  { %v636_v55 = vpop.f32.mrb[15].mxu0 }
 0x9b6   :  { %v639_v56 = vmul.f32 %v638_v51, %v1818_v15  ;;  %v711_v57 = vmul.f32 %v710_v52, %v1818_v15 }
 0x9b8   :  { %1691 = vtanh.f32 %v639_v56 }
 0x9b9   :  { %1693 = vtanh.f32 %v711_v57 }
 0x9c2   :  { %v1692_v59 = vpop.eup %1691 }
 0x9c3   :  { %v1694_v60 = vpop.eup %1693  ;;  %v641_v61 = vmul.f32 %v1692_v59, %v1818_v15 }
 0x9c4   :  { %v713_v63 = vmul.f32 %v1694_v60, %v1818_v15 }
 0x9c5   :  { %v642_v2 = vadd.f32 %v641_v61, %v1821_v20 }
 0x9c6   :  { %v714_v3 = vadd.f32 %v713_v63, %v1821_v20 }
 0x9c7   :  { %645 = vrot.lane.b32.xlu1 %v642_v2, %s1741_s1  ;;  %v643_v11 = vmul.f32 %v642_v2, %v2068_v7 }
 0x9c8   :  { %717 = vrot.lane.b32.xlu0 %v714_v3, %s1741_s1  ;;  %v715_v14 = vmul.f32 %v714_v3, %v2074_v9 }
 0xa39   :  { %v646_v8 = vpop.permute.xlu1 %645 }
 0xa3a   :  { %v718_v4 = vpop.permute.xlu0 %717  ;;  %v648_v5 = vmul.f32 %v646_v8, %v642_v2 }
 0xa3b   :  { %v720_v6 = vmul.f32 %v718_v4, %v714_v3 }
 0xa3c   :  { %650 = vrot.lane.b32.xlu1 %v648_v5, %s1742_s2 }
 0xa3d   :  { %722 = vrot.lane.b32.xlu0 %v720_v6, %s1742_s2 }
 0xaae   :  { %v651_v16 = vpop.permute.xlu1 %650 }
 0xaaf   :  { %v723_v21 = vpop.permute.xlu0 %722  ;;  %v2078_v23 = vadd.f32 %v651_v16, %v643_v11 }
 0xab0   :  { %v2080_v24 = vadd.f32 %v723_v21, %v715_v14 }
 0xab1   :  { %1695 = vtanh.f32 %v2078_v23 }
 0xab2   :  { %1697 = vtanh.f32 %v2080_v24 }
 0xabb   :  { %v1696_v17 = vpop.eup %1695 }
 0xabc   :  { %v1698_v25 = vpop.eup %1697  ;;  %656 = vrot.lane.b32.xlu1 %v1696_v17, %s1741_s1 }
 0xabd   :  { %728 = vrot.lane.b32.xlu0 %v1698_v25, %s1741_s1 }
 0xb2e   :  { %v657_v18 = vpop.permute.xlu1 %656 }
 0xb2f   :  { %v729_v26 = vpop.permute.xlu0 %728  ;;  %v659_v27 = vmul.f32 %v657_v18, %v642_v2  ;;  %v2132_v2 = vsel %vm565_vm0, %v2078_v23, %v2068_v7 }
 0xb30   :  { %v731_v62 = vmul.f32 %v729_v26, %v714_v3  ;;  %v2138_v3 = vsel %vm709_vm1, %v2080_v24, %v2074_v9 }
 0xb31   :  { %v2090_v32 = vsel %vm565_vm0, %v659_v27, %v2026_v36 }
 0xb32   :  { %v2095_v58 = vsel %vm709_vm1, %v731_v62, %v2031_v37  ;;  %v662_v1 = vpack.c.bf16 %v2090_v32, %v2090_v32 }
 0xb33   :  { %v734_v34 = vpack.c.bf16 %v2095_v58, %v2095_v58 }
 0xb34   :  { %664 = vrot.lane.b32.xlu1 %v662_v1, %s1742_s2 }
 0xb35   :  { %736 = vrot.lane.b32.xlu0 %v734_v34, %s1742_s2 }
 0xba6   :  { %v665_v35 = vpop.permute.xlu1 %664 }
 0xba7   :  { %v737_v38 = vpop.permute.xlu0 %736  ;;  %1585 = vmatmul.mubr.msk.bf16.vlgmr.msra.gmra.mrb[12].mxu1 %vm293_vm7, %v665_v35 }
 0xba8   :  { %1498 = vmatmul.mubr.msk.bf16.vlgmr.msra.gmra.mrb[16].mxu0 %vm293_vm7, %v737_v38  ;;  %1589 = vmatpush3.bf16.msra.mxu1 %v1919_v12 }
 0xba9   :  { %886 = vmatpush1.bf16.msra.mxu0 %v1830_v28  ;;  %1590 = vmatprep.subr.bf16.mxu1 %v1739_v10 }
 0xbaa   :  { %887 = vmatprep.subr.bf16.mxu0 %v1840_v30  ;;  %917 = vmatprep.mubr.bf16.mxu0 %v1738_v0 }
 0xbab   :  { %1592 = vmatprep.mubr.msk.bf16.mxu1 %vm1743_vm8, %v1739_v10 }
 0xbac   :  { %1591 = vmatpush3.bf16.msra.mxu1 %v1927_v13 }
 0xbad   :  { %888 = vmatpush1.bf16.msra.mxu0 %v1848_v31  ;;  %1596 = vmatprep.subr.bf16.mxu1 %v1739_v10 }
 0xbae   :  { %1029 = vmatprep.subr.bf16.mxu0 %v1835_v29 }
 0xc7a   :  { %v703_v36 = vpop.f32.mrb[12].mxu1 }
 0xc7b   :  { %v775_v37 = vpop.f32.mrb[16].mxu0  ;;  %v704_v40 = vadd.f32 %v1872_v39, %v703_v36  ;;  %v1586_v41 = vpop.f32.mrb[13].mxu1 }
 0xc7c   :  { %v777_v42 = vpop.f32.mrb[17].mxu0  ;;  %v706_v19 = vpop.f32.mrb[14].mxu1 }
 0xc7d   :  { %v782_v22 = vadd.f32 %v775_v37, %v704_v40  ;;  %v854_v43 = vadd.f32 %v777_v42, %v1984_v46  ;;  %v779_v44 = vpop.f32.mrb[18].mxu0  ;;  %v1587_v49 = vpop.f32.mrb[15].mxu1 }
 0xc7e   :  { %v780_v50 = vpop.f32.mrb[19].mxu0 }
 0xc7f   :  { %v783_v51 = vmul.f32 %v782_v22, %v1818_v15  ;;  %v855_v52 = vmul.f32 %v854_v43, %v1818_v15 }
 0xc81   :  { %1699 = vtanh.f32 %v783_v51 }
 0xc82   :  { %1701 = vtanh.f32 %v855_v52 }
 0xc8b   :  { %v1700_v53 = vpop.eup %1699 }
 0xc8c   :  { %v1702_v54 = vpop.eup %1701  ;;  %v785_v55 = vmul.f32 %v1700_v53, %v1818_v15 }
 0xc8d   :  { %v857_v56 = vmul.f32 %v1702_v54, %v1818_v15 }
 0xc8e   :  { %v786_v57 = vadd.f32 %v785_v55, %v1821_v20 }
 0xc8f   :  { %v858_v59 = vadd.f32 %v857_v56, %v1821_v20 }
 0xc90   :  { %789 = vrot.lane.b32.xlu1 %v786_v57, %s1741_s1  ;;  %v787_v8 = vmul.f32 %v786_v57, %v2132_v2 }
 0xc91   :  { %861 = vrot.lane.b32.xlu0 %v858_v59, %s1741_s1  ;;  %v859_v4 = vmul.f32 %v858_v59, %v2138_v3 }
 0xd02   :  { %v790_v46 = vpop.permute.xlu1 %789 }
 0xd03   :  { %v862_v60 = vpop.permute.xlu0 %861  ;;  %v792_v61 = vmul.f32 %v790_v46, %v786_v57 }
 0xd04   :  { %v864_v63 = vmul.f32 %v862_v60, %v858_v59 }
 0xd05   :  { %794 = vrot.lane.b32.xlu1 %v792_v61, %s1742_s2 }
 0xd06   :  { %866 = vrot.lane.b32.xlu0 %v864_v63, %s1742_s2 }
 0xd77   :  { %v795_v5 = vpop.permute.xlu1 %794 }
 0xd78   :  { %v867_v6 = vpop.permute.xlu0 %866  ;;  %v2142_v11 = vadd.f32 %v795_v5, %v787_v8 }
 0xd79   :  { %v869_v14 = vadd.f32 %v867_v6, %v859_v4 }
 0xd7a   :  { %1703 = vtanh.f32 %v2142_v11 }
 0xd7b   :  { %1705 = vtanh.f32 %v869_v14  ;;  %v2192_v55 = vsel %vm853_vm2, %v869_v14, %v2138_v3 }
 0xd84   :  { %v1704_v7 = vpop.eup %1703 }
 0xd85   :  { %v1706_v16 = vpop.eup %1705  ;;  %800 = vrot.lane.b32.xlu1 %v1704_v7, %s1741_s1 }
 0xd86   :  { %872 = vrot.lane.b32.xlu0 %v1706_v16, %s1741_s1 }
 0xdf7   :  { %v801_v9 = vpop.permute.xlu1 %800 }
 0xdf8   :  { %v873_v21 = vpop.permute.xlu0 %872  ;;  %v803_v23 = vmul.f32 %v801_v9, %v786_v57  ;;  %v2199_v57 = vsel %vm709_vm1, %v2142_v11, %v2132_v2 }
 0xdf9   :  { %v875_v24 = vmul.f32 %v873_v21, %v858_v59 }
 0xdfa   :  { %v2151_v17 = vsel %vm709_vm1, %v803_v23, %v2090_v32 }
 0xdfb   :  { %v2156_v25 = vsel %vm853_vm2, %v875_v24, %v2095_v58  ;;  %v806_v18 = vpack.c.bf16 %v2151_v17, %v2151_v17 }
 0xdfc   :  { %v878_v26 = vpack.c.bf16 %v2156_v25, %v2156_v25 }
 0xdfd   :  { %808 = vrot.lane.b32.xlu1 %v806_v18, %s1742_s2 }
 0xdfe   :  { %880 = vrot.lane.b32.xlu0 %v878_v26, %s1742_s2 }
 0xe6f   :  { %v809_v27 = vpop.permute.xlu1 %808 }
 0xe70   :  { %v881_v62 = vpop.permute.xlu0 %880  ;;  %1593 = vmatmul.mubr.msk.bf16.vlgmr.msra.gmra.mrb[16].mxu1 %vm293_vm7, %v809_v27 }
 0xe71   :  { %1500 = vmatmul.mubr.msk.bf16.vlgmr.msra.gmra.mrb[20].mxu0 %vm293_vm7, %v881_v62  ;;  %1597 = vmatpush3.bf16.msra.mxu1 %v1919_v12 }
 0xe72   :  { %1030 = vmatpush1.bf16.msra.mxu0 %v1830_v28  ;;  %1598 = vmatprep.subr.bf16.mxu1 %v1739_v10 }
 0xe73   :  { %1031 = vmatprep.subr.bf16.mxu0 %v1840_v30  ;;  %1061 = vmatprep.mubr.bf16.mxu0 %v1738_v0 }
 0xe74   :  { %1600 = vmatprep.mubr.msk.bf16.mxu1 %vm1743_vm8, %v1739_v10 }
 0xe75   :  { %1599 = vmatpush3.bf16.msra.mxu1 %v1927_v13 }
 0xe76   :  { %1032 = vmatpush1.bf16.msra.mxu0 %v1848_v31  ;;  %1604 = vmatprep.subr.bf16.mxu1 %v1739_v10 }
 0xe77   :  { %1173 = vmatprep.subr.bf16.mxu0 %v1835_v29 }
 0xf43   :  { %v847_v32 = vpop.f32.mrb[16].mxu1 }
 0xf44   :  { %v919_v58 = vpop.f32.mrb[20].mxu0  ;;  %v848_v1 = vadd.f32 %v1872_v39, %v847_v32  ;;  %v1594_v34 = vpop.f32.mrb[17].mxu1 }
 0xf45   :  { %v921_v35 = vpop.f32.mrb[21].mxu0  ;;  %v850_v38 = vpop.f32.mrb[18].mxu1 }
 0xf46   :  { %v998_v36 = vadd.f32 %v1982_v45, %v921_v35  ;;  %v926_v37 = vadd.f32 %v919_v58, %v848_v1  ;;  %v923_v40 = vpop.f32.mrb[22].mxu0  ;;  %v1595_v41 = vpop.f32.mrb[19].mxu1 }
 0xf47   :  { %v924_v42 = vpop.f32.mrb[23].mxu0 }
 0xf48   :  { %v999_v19 = vmul.f32 %v998_v36, %v1818_v15  ;;  %v927_v22 = vmul.f32 %v926_v37, %v1818_v15 }
 0xf4a   :  { %1707 = vtanh.f32 %v999_v19 }
 0xf4b   :  { %1709 = vtanh.f32 %v927_v22 }
 0xf54   :  { %v1708_v29 = vpop.eup %1707 }
 0xf55   :  { %v1710_v43 = vpop.eup %1709  ;;  %v1001_v44 = vmul.f32 %v1708_v29, %v1818_v15 }
 0xf56   :  { %v929_v49 = vmul.f32 %v1710_v43, %v1818_v15 }
 0xf57   :  { %v1002_v50 = vadd.f32 %v1001_v44, %v1821_v20 }
 0xf58   :  { %v930_v45 = vadd.f32 %v929_v49, %v1821_v20 }
 0xf59   :  { %1005 = vrot.lane.b32.xlu0 %v1002_v50, %s1741_s1  ;;  %v1003_v56 = vmul.f32 %v1002_v50, %v2192_v55 }
 0xf5a   :  { %933 = vrot.lane.b32.xlu1 %v930_v45, %s1741_s1  ;;  %v931_v46 = vmul.f32 %v930_v45, %v2199_v57 }
 0xfcb   :  { %v1006_v51 = vpop.permute.xlu0 %1005 }
 0xfcc   :  { %v1008_v52 = vmul.f32 %v1006_v51, %v1002_v50  ;;  %v934_v53 = vpop.permute.xlu1 %933 }
 0xfcd   :  { %v936_v54 = vmul.f32 %v934_v53, %v930_v45 }
 0xfce   :  { %1010 = vrot.lane.b32.xlu0 %v1008_v52, %s1742_s2 }
 0xfcf   :  { %938 = vrot.lane.b32.xlu1 %v936_v54, %s1742_s2 }
0x1040   :  { %v1011_v59 = vpop.permute.xlu0 %1010 }
0x1041   :  { %v2202_v60 = vadd.f32 %v1011_v59, %v1003_v56  ;;  %v939_v61 = vpop.permute.xlu1 %938 }
0x1042   :  { %v2204_v63 = vadd.f32 %v939_v61, %v931_v46 }
0x1043   :  { %1711 = vtanh.f32 %v2202_v60  ;;  %v2255_v42 = vsel %vm997_vm3, %v2202_v60, %v2192_v55 }
0x1044   :  { %1713 = vtanh.f32 %v2204_v63  ;;  %v2262_v29 = vsel %vm853_vm2, %v2204_v63, %v2199_v57 }
0x104d   :  { %v1712_v3 = vpop.eup %1711 }
0x104e   :  { %v1714_v8 = vpop.eup %1713  ;;  %1016 = vrot.lane.b32.xlu0 %v1712_v3, %s1741_s1 }
0x104f   :  { %944 = vrot.lane.b32.xlu1 %v1714_v8, %s1741_s1 }
0x10c0   :  { %v1017_v2 = vpop.permute.xlu0 %1016 }
0x10c1   :  { %v1019_v4 = vmul.f32 %v1017_v2, %v1002_v50  ;;  %v945_v5 = vpop.permute.xlu1 %944 }
0x10c2   :  { %v947_v6 = vmul.f32 %v945_v5, %v930_v45 }
0x10c3   :  { %v2214_v11 = vsel %vm997_vm3, %v1019_v4, %v2156_v25 }
0x10c4   :  { %v1022_v14 = vpack.c.bf16 %v2214_v11, %v2214_v11  ;;  %v2221_v7 = vsel %vm853_vm2, %v947_v6, %v2151_v17 }
0x10c5   :  { %v950_v16 = vpack.c.bf16 %v2221_v7, %v2221_v7 }
0x10c6   :  { %1024 = vrot.lane.b32.xlu0 %v1022_v14, %s1742_s2 }
0x10c7   :  { %952 = vrot.lane.b32.xlu1 %v950_v16, %s1742_s2 }
0x1138   :  { %v1025_v9 = vpop.permute.xlu0 %1024 }
0x1139   :  { %1502 = vmatmul.mubr.msk.bf16.vlgmr.msra.gmra.mrb[24].mxu0 %vm293_vm7, %v1025_v9  ;;  %v953_v21 = vpop.permute.xlu1 %952 }
0x113a   :  { %1601 = vmatmul.mubr.msk.bf16.vlgmr.msra.gmra.mrb[20].mxu1 %vm293_vm7, %v953_v21  ;;  %1174 = vmatpush1.bf16.msra.mxu0 %v1830_v28 }
0x113b   :  { %1605 = vmatpush3.bf16.msra.mxu1 %v1919_v12  ;;  %1175 = vmatprep.subr.bf16.mxu0 %v1840_v30 }
0x113c   :  { %1205 = vmatprep.mubr.bf16.mxu0 %v1738_v0  ;;  %1606 = vmatprep.subr.bf16.mxu1 %v1739_v10 }
0x113d   :  { %1608 = vmatprep.mubr.msk.bf16.mxu1 %vm1743_vm8, %v1739_v10 }
0x113e   :  { %1176 = vmatpush1.bf16.msra.mxu0 %v1848_v31 }
0x113f   :  { %1607 = vmatpush3.bf16.msra.mxu1 %v1927_v13 }
0x1140   :  { %1612 = vmatprep.subr.bf16.mxu1 %v1739_v10 }
0x120c   :  { %v1063_v23 = vpop.f32.mrb[24].mxu0 }
0x120d   :  { %v1065_v24 = vpop.f32.mrb[25].mxu0  ;;  %v991_v28 = vpop.f32.mrb[20].mxu1 }
0x120e   :  { %v1142_v17 = vadd.f32 %v1065_v24, %v1988_v48  ;;  %v1067_v25 = vpop.f32.mrb[26].mxu0  ;;  %v992_v30 = vadd.f32 %v1872_v39, %v991_v28  ;;  %v1602_v0 = vpop.f32.mrb[21].mxu1 }
0x120f   :  { %v1068_v18 = vpop.f32.mrb[27].mxu0  ;;  %v994_v26 = vpop.f32.mrb[22].mxu1 }
0x1210   :  { %v1143_v27 = vmul.f32 %v1142_v17, %v1818_v15  ;;  %v1070_v62 = vadd.f32 %v1063_v23, %v992_v30  ;;  %v1603_v32 = vpop.f32.mrb[23].mxu1 }
0x1212   :  { %1715 = vtanh.f32 %v1143_v27  ;;  %v1071_v31 = vmul.f32 %v1070_v62, %v1818_v15 }
0x1214   :  { %1717 = vtanh.f32 %v1071_v31 }
0x121c   :  { %v1716_v58 = vpop.eup %1715 }
0x121d   :  { %v1145_v1 = vmul.f32 %v1716_v58, %v1818_v15 }
0x121e   :  { %v1718_v34 = vpop.eup %1717 }
0x121f   :  { %v1146_v48 = vadd.f32 %v1145_v1, %v1821_v20  ;;  %v1073_v35 = vmul.f32 %v1718_v34, %v1818_v15 }
0x1221   :  { %1149 = vrot.lane.b32.xlu0 %v1146_v48, %s1741_s1  ;;  %v1074_v38 = vadd.f32 %v1073_v35, %v1821_v20  ;;  %v1147_v19 = vmul.f32 %v1146_v48, %v2255_v42 }
0x1223   :  { %1077 = vrot.lane.b32.xlu1 %v1074_v38, %s1741_s1  ;;  %v1075_v44 = vmul.f32 %v1074_v38, %v2262_v29 }
0x1293   :  { %v1150_v36 = vpop.permute.xlu0 %1149 }
0x1294   :  { %v1152_v37 = vmul.f32 %v1150_v36, %v1146_v48 }
0x1295   :  { %v1078_v40 = vpop.permute.xlu1 %1077 }
0x1296   :  { %1154 = vrot.lane.b32.xlu0 %v1152_v37, %s1742_s2  ;;  %v1080_v41 = vmul.f32 %v1078_v40, %v1074_v38 }
0x1298   :  { %1082 = vrot.lane.b32.xlu1 %v1080_v41, %s1742_s2 }
0x1308   :  { %v1155_v22 = vpop.permute.xlu0 %1154 }
0x1309   :  { %v1157_v43 = vadd.f32 %v1155_v22, %v1147_v19  ;;  %v1735_v22 = vld [vmem:[%s2370_s3] ss:$8 sps:$4 sm:$0xff]  }
0x130a   :  { %v1083_v49 = vpop.permute.xlu1 %1082 }
0x130b   :  { %1719 = vtanh.f32 %v1157_v43  ;;  %v1085_v50 = vadd.f32 %v1083_v49, %v1075_v44  ;;  %v1165_v0 = vsel %vm1141_vm4, %v1157_v43, %v2255_v42  ;;  %v1737_v49 = vld [vmem:[%s2371_s5] ss:$0 sm:$0xff] }
0x130d   :  { %1721 = vtanh.f32 %v1085_v50  ;;  %v1093_v62 = vsel %vm997_vm3, %v1085_v50, %v2262_v29  ;;  %v1736_v29 = vld [vmem:[%s2370_s3 + $0x10] ss:$8 sps:$4 sm:$0xff]  }
0x1315   :  { %v1720_v45 = vpop.eup %1719 }
0x1316   :  { %1160 = vrot.lane.b32.xlu0 %v1720_v45, %s1741_s1 }
0x1317   :  { %v1722_v51 = vpop.eup %1721 }
0x1318   :  { %1088 = vrot.lane.b32.xlu1 %v1722_v51, %s1741_s1 }
0x1388   :  { %v1161_v52 = vpop.permute.xlu0 %1160 }
0x1389   :  { %v1163_v53 = vmul.f32 %v1161_v52, %v1146_v48 }
0x138a   :  { %v1089_v54 = vpop.permute.xlu1 %1088 }
0x138b   :  { %v1091_v55 = vmul.f32 %v1089_v54, %v1074_v38  ;;  %v2271_v56 = vsel %vm1141_vm4, %v1163_v53, %v2214_v11 }
0x138c   :  { %v1166_v57 = vpack.c.bf16 %v2271_v56, %v2271_v56 }
0x138d   :  { %v2278_v59 = vsel %vm997_vm3, %v1091_v55, %v2221_v7 }
0x138e   :  { %1168 = vrot.lane.b32.xlu0 %v1166_v57, %s1742_s2  ;;  %v1094_v46 = vpack.c.bf16 %v2278_v59, %v2278_v59 }
0x1390   :  { %1096 = vrot.lane.b32.xlu1 %v1094_v46, %s1742_s2 }
0x1400   :  { %v1169_v60 = vpop.permute.xlu0 %1168 }
0x1401   :  { %1504 = vmatmul.mubr.msk.bf16.vlgmr.msra.gmra.mrb[28].mxu0 %vm293_vm7, %v1169_v60 }
0x1402   :  { %v1097_v61 = vpop.permute.xlu1 %1096  ;;  %1636 = vmatprep.mubr.msk.f32.mxu0 %vm1743_vm8, %v1739_v10 }
0x1403   :  { %1609 = vmatmul.mubr.msk.bf16.vlgmr.msra.gmra.mrb[24].mxu1 %vm293_vm7, %v1097_v61 }
0x1404   :  { %1613 = vmatpush3.bf16.msra.mxu1 %v1919_v12  ;;  %1616 = vmatprep.mubr.msk.bf16.mxu1 %vm1743_vm8, %v1739_v10 }
0x1405   :  { %1614 = vmatprep.subr.bf16.mxu1 %v1739_v10 }
0x1408   :  { %1615 = vmatpush3.bf16.msra.mxu1 %v1927_v13 }
0x1409   :  { %1620 = vmatprep.subr.bf16.mxu1 %v1739_v10 }
0x14d4   :  { %v1207_v63 = vpop.f32.mrb[28].mxu0 }
0x14d5   :  { %v1209_v3 = vpop.f32.mrb[29].mxu0 }
0x14d6   :  { %v1286_v8 = vadd.f32 %v1986_v47, %v1209_v3  ;;  %v1211_v2 = vpop.f32.mrb[30].mxu0  ;;  %v1135_v4 = vpop.f32.mrb[24].mxu1  ;;  %v1380_v3 = vld [vmem:[%s2373_s6 + $0x10] sm:$0xff] }
0x14d7   :  { %v1212_v5 = vpop.f32.mrb[31].mxu0  ;;  %v1136_v6 = vadd.f32 %v1872_v39, %v1135_v4  ;;  %v1610_v11 = vpop.f32.mrb[25].mxu1  ;;  %v1381_v2 = vld [vmem:[%s2373_s6 + $0x18] sm:$0xff] }
0x14d8   :  { %v1287_v12 = vmul.f32 %v1286_v8, %v1818_v15  ;;  %v1138_v14 = vpop.f32.mrb[26].mxu1  ;;  %v1647_v4 = vpack.c.bf16 %v1381_v2, %v1380_v3 }
0x14d9   :  { %v1214_v7 = vadd.f32 %v1207_v63, %v1136_v6  ;;  %v1611_v16 = vpop.f32.mrb[27].mxu1  ;;  %v1744_v63 = vmov 0.0|0.0  }
0x14da   :  { %1723 = vtanh.f32 %v1287_v12  ;;  %1643 = vmatprep.subr.bf16.mxu0 %v1744_v63 }
0x14db   :  { %v1215_v13 = vmul.f32 %v1214_v7, %v1818_v15  ;;  %v1507_v7 = vld [vmem:[%s2374_s7] ss:$0 sm:$0xff] }
0x14dd   :  { %1725 = vtanh.f32 %v1215_v13 }
0x14e4   :  { %v1724_v9 = vpop.eup %1723 }
0x14e5   :  { %v1289_v21 = vmul.f32 %v1724_v9, %v1818_v15 }
0x14e7   :  { %v1726_v23 = vpop.eup %1725  ;;  %v1290_v47 = vadd.f32 %v1289_v21, %v1821_v20 }
0x14e8   :  { %v1217_v24 = vmul.f32 %v1726_v23, %v1818_v15 }
0x14e9   :  { %1293 = vrot.lane.b32.xlu0 %v1290_v47, %s1741_s1  ;;  %v1291_v18 = vmul.f32 %v1290_v47, %v1165_v0 }
0x14ea   :  { %v1218_v39 = vadd.f32 %v1217_v24, %v1821_v20 }
0x14ec   :  { %1221 = vrot.lane.b32.xlu1 %v1218_v39, %s1741_s1  ;;  %v1219_v32 = vmul.f32 %v1218_v39, %v1093_v62 }
0x155b   :  { %v1294_v28 = vpop.permute.xlu0 %1293 }
0x155c   :  { %v1296_v17 = vmul.f32 %v1294_v28, %v1290_v47 }
0x155e   :  { %1298 = vrot.lane.b32.xlu0 %v1296_v17, %s1742_s2  ;;  %v1222_v25 = vpop.permute.xlu1 %1221 }
0x155f   :  { %v1224_v30 = vmul.f32 %v1222_v25, %v1218_v39 }
0x1561   :  { %1226 = vrot.lane.b32.xlu1 %v1224_v30, %s1742_s2 }
0x15d0   :  { %v1299_v26 = vpop.permute.xlu0 %1298 }
0x15d1   :  { %v1301_v27 = vadd.f32 %v1299_v26, %v1291_v18 }
0x15d3   :  { %1727 = vtanh.f32 %v1301_v27  ;;  %v1227_v31 = vpop.permute.xlu1 %1226 }
0x15d4   :  { %v1229_v58 = vadd.f32 %v1227_v31, %v1219_v32 }
0x15d6   :  { %1729 = vtanh.f32 %v1229_v58 }
0x15dd   :  { %v1728_v1 = vpop.eup %1727 }
0x15de   :  { %1304 = vrot.lane.b32.xlu0 %v1728_v1, %s1741_s1 }
0x15e0   :  { %v1730_v34 = vpop.eup %1729 }
0x15e1   :  { %1232 = vrot.lane.b32.xlu1 %v1730_v34, %s1741_s1 }
0x1650   :  { %v1305_v48 = vpop.permute.xlu0 %1304 }
0x1651   :  { %v1307_v35 = vmul.f32 %v1305_v48, %v1290_v47 }
0x1653   :  { %v1233_v38 = vpop.permute.xlu1 %1232  ;;  %v1308_v36 = vsel %vm1285_vm5, %v1307_v35, %v2271_v56 }
0x1654   :  { %v1235_v37 = vmul.f32 %v1233_v38, %v1218_v39  ;;  %v1309_v40 = vpack.c.bf16 %v1308_v36, %v1308_v36 }
0x1656   :  { %1311 = vrot.lane.b32.xlu0 %v1309_v40, %s1742_s2  ;;  %v1236_v41 = vsel %vm1141_vm4, %v1235_v37, %v2278_v59  ;;  %v1237_v59 = vsel %vm1141_vm4, %v1229_v58, %v1093_v62 }
0x1657   :  { %v1238_v42 = vpack.c.bf16 %v1236_v41, %v1236_v41 }
0x1659   :  { %1240 = vrot.lane.b32.xlu1 %v1238_v42, %s1742_s2 }
0x16c8   :  { %v1312_v43 = vpop.permute.xlu0 %1311 }
0x16cb   :  { %v1241_v19 = vpop.permute.xlu1 %1240 }
0x16cc   :  { %1617 = vmatmul.mubr.msk.bf16.vlgmr.msra.gmra.mrb[28].mxu1 %vm293_vm7, %v1241_v19 }
0x16cd   :  { %1621 = vmatpush3.bf16.msra.mxu1 %v1735_v22  ;;  %1624 = vmatprep.mubr.msk.bf16.mxu1 %vm1743_vm8, %v1739_v10 }
0x16ce   :  { %1622 = vmatprep.subr.bf16.mxu1 %v1739_v10 }
0x16d1   :  { %1623 = vmatpush3.bf16.msra.mxu1 %v1736_v29 }
0x16d8   :  { %1625 = vmatmul.mubr.msk.bf16.vlgmr.msra.gmra.mrb[28].mxu1 %vm293_vm7, %v1312_v43 }
0x17ab   :  { %v1350_v44 = vpop.f32.mrb[28].mxu1 }
0x17ac   :  { %v1649_v50 = vadd.f32 %v1737_v49, %v1350_v44  ;;  %v1626_v45 = vpop.f32.mrb[29].mxu1 }
0x17ad   :  { %v1353_v51 = vpop.f32.mrb[30].mxu1 }
0x17ae   :  { %v1356_v52 = vmul.f32 %v1649_v50, %v1818_v15  ;;  %v1627_v53 = vpop.f32.mrb[31].mxu1 }
0x17b0   :  { %1731 = vtanh.f32 %v1356_v52 }
0x17ba   :  { %v1732_v10 = vpop.eup %1731 }
0x17bb   :  { %v1358_v54 = vmul.f32 %v1732_v10, %v1818_v15  ;;  %v1378_v15 = vld [vmem:[%s2373_s6] sm:$0xff] }
0x17bd   :  { %v1359_v55 = vadd.f32 %v1358_v54, %v1821_v20  ;;  %v1379_v20 = vld [vmem:[%s2373_s6 + $0x8] sm:$0xff] }
0x17be   :  { %v1644_v8 = vpack.c.bf16 %v1379_v20, %v1378_v15 }
0x17bf   :  { %1362 = vrot.lane.b32.xlu1 %v1359_v55, %s1741_s1  ;;  %v1360_v46 = vmul.f32 %v1359_v55, %v1237_v59 }
0x17c0   :  { %1645 = vmatpush3.bf16.msra.mxu0 %v1644_v8 }
0x17c1   :  { %1646 = vmatprep.subr.bf16.mxu0 %v1744_v63 }
0x17c4   :  { %1648 = vmatpush3.bf16.msra.mxu0 %v1647_v4 }
0x1831   :  { %v1363_v56 = vpop.permute.xlu1 %1362 }
0x1832   :  { %v1365_v57 = vmul.f32 %v1363_v56, %v1359_v55 }
0x1834   :  { %1367 = vrot.lane.b32.xlu0 %v1365_v57, %s1742_s2 }
0x18a6   :  { %v1368_v60 = vpop.permute.xlu0 %1367 }
0x18a7   :  { %v1370_v61 = vadd.f32 %v1368_v60, %v1360_v46 }
0x18a9   :  { %1733 = vtanh.f32 %v1370_v61 }
0x18b3   :  { %v1734_v5 = vpop.eup %1733 }
0x18b4   :  { %1373 = vrot.lane.b32.xlu1 %v1734_v5, %s1741_s1 }
0x1926   :  { %v1374_v6 = vpop.permute.xlu1 %1373 }
0x1927   :  { %v1376_v11 = vmul.f32 %v1374_v6, %v1359_v55 }
0x1929   :  { %v1377_v12 = vsel %vm1285_vm5, %v1376_v11, %v1236_v41 }
0x192a   :  { %1390 = vrot.lane.b32.xlu0 %v1377_v12, %s1742_s2 }
0x199c   :  { %v1391_v14 = vpop.permute.xlu0 %1390 }
0x199d   :  { %1637 = vmatmul.mubr.msk.f32.vlgmr.msra.gmra.mrb[32].mxu0 %vm293_vm7, %v1391_v14 }
0x1a70   :  { %v1460_v16 = vpop.f32.mrb[32].mxu0 }
0x1a71   :  { %v1461_v13 = vadd.f32 %v1507_v7, %v1460_v16  ;;  %v1638_v9 = vpop.f32.mrb[33].mxu0 }
0x1a73   :  { %1464 = vst [vmem:[%s2375_s8] sm:$0xff] %v1461_v13 }

</bundles_post_ra>
